<compile_context>
chip_gen: v7x
topology: tpu7x:2x2x1
jax: 0.10.0
libtpu: 0.0.40
codegen_flags: <defaults>
</compile_context>

<pallas_src>
import numpy as np

import jax
import jax.numpy as jnp
from jax import lax
from jax.experimental import pallas as pl
from jax.experimental.pallas import tpu as pltpu

EPS = 1e-5  # nn.BatchNorm2d default eps


# --------------------------- one-time preparation ----------------------------

def _stacked_sel(B, H, W, kh, kw, stride, pad):
    """Row-stacked 0/1 tap-selection matrix on (b,h,w)-flattened rows.

    Block t (rows [t*m_pad, t*m_pad+m_out)) gathers the input rows for tap t;
    out-of-range (zero-padding) rows and the m_pad-alignment rows are all-zero.
    """
    OH = (H + 2 * pad - kh) // stride + 1
    OW = (W + 2 * pad - kw) // stride + 1
    m_out = B * OH * OW
    m_pad = ((m_out + 7) // 8) * 8           # sublane-aligned tap blocks
    T = kh * kw
    sel = np.zeros((T * m_pad, B * H * W), np.float32)
    for i in range(kh):
        for j in range(kw):
            t = i * kw + j
            for b in range(B):
                for oh in range(OH):
                    for ow in range(OW):
                        h = stride * oh - pad + i
                        w = stride * ow - pad + j
                        if 0 <= h < H and 0 <= w < W:
                            sel[t * m_pad + (b * OH + oh) * OW + ow,
                                (b * H + h) * W + w] = 1.0
    return sel, OH, OW, m_out, m_pad, T


def _wcat(w_oihw, cin_pad, cout_pad):
    """PyTorch (O,I,kh,kw) -> K-concatenated (kh*kw*cin_pad, cout_pad) bf16."""
    w = np.asarray(w_oihw, np.float32)
    O, I, kh, kw = w.shape
    wt = w.transpose(2, 3, 1, 0)                         # (kh, kw, I, O)
    out = np.zeros((kh * kw, cin_pad, cout_pad), np.float32)
    out[:, :I, :O] = wt.reshape(kh * kw, I, O)
    return jnp.asarray(out.reshape(kh * kw * cin_pad, cout_pad), jnp.bfloat16)


def prepare_dqn(params, B, H, W):
    """One-time weight reshuffle + stacked selection-matrix construction."""
    C_IN = params["w1"].shape[1]                 # 32
    C2 = params["w2"].shape[0]                   # 128
    C3 = params["w3"].shape[0]                   # 256
    C4 = params["w4"].shape[0]                   # 512
    CP = 128                                     # lane padding for early stages

    sc1, H1, W1, m1, m1p, t1 = _stacked_sel(B, H, W, 2, 2, 2, 1)       # conv1
    sp1, Hq1, Wq1, q1, q1p, _ = _stacked_sel(B, H1, W1, 2, 2, 1, 1)    # pool1
    sc2, H2, W2, m2, m2p, t2 = _stacked_sel(B, Hq1, Wq1, 2, 2, 2, 1)   # conv2
    sp2, Hq2, Wq2, q2, q2p, _ = _stacked_sel(B, H2, W2, 2, 2, 1, 1)    # pool2
    sc3, H3, W3, m3, m3p, t3 = _stacked_sel(B, Hq2, Wq2, 3, 3, 2, 0)   # conv3
    S = H3 * W3                                  # spatial positions after conv4

    K, N = params["wfc"].shape
    assert K == C4 * S, "fc1 input size does not match flattened conv4 output"
    npad = max(128, ((N + 127) // 128) * 128)    # lane-dense fc output

    # fc weight: fold the PyTorch NCHW flatten (k = c*S + s) into our lane
    # order (s*C4 + c); pad the output dim to npad lanes.
    wpad = np.zeros((K, npad), np.float32)
    wpad[:, :N] = np.asarray(params["wfc"], np.float32)
    wfc = wpad.reshape(C4, S, npad).transpose(1, 0, 2).reshape(S * C4, npad)
    bfc = np.zeros((1, npad), np.float32)
    bfc[0, :N] = np.asarray(params["bfc"], np.float32)

    # BN gamma/beta stacked as rows [2*l, 2*l+1]; layer-1's padded channels get
    # gamma=beta=0 so the padded lanes stay exactly zero through bn/relu/pool.
    cmax = max(CP, C2, C3, C4)
    pbn = np.zeros((8, cmax), np.float32)
    for l, (g, bta) in enumerate([(params["g1"], params["bb1"]),
                                  (params["g2"], params["bb2"]),
                                  (params["g3"], params["bb3"]),
                                  (params["g4"], params["bb4"])]):
        c = np.asarray(g).shape[0]
        pbn[2 * l, :c] = np.asarray(g, np.float32)
        pbn[2 * l + 1, :c] = np.asarray(bta, np.float32)

    bf16 = jnp.bfloat16
    return {
        # static geometry (python ints baked into the kernel closure)
        "B": B, "H": H, "W": W, "S": S, "outputs": N, "npad": npad,
        "cin": C_IN, "cp": CP, "c2": C2, "c3": C3, "c4": C4,
        "m1": m1, "m1p": m1p, "t1": t1, "q1": q1, "q1p": q1p,
        "m2": m2, "m2p": m2p, "t2": t2, "q2": q2, "q2p": q2p,
        "m3": m3, "m3p": m3p, "t3": t3,
        # tensors
        "sc1": jnp.asarray(sc1, bf16), "sp1": jnp.asarray(sp1, bf16),
        "sc2": jnp.asarray(sc2, bf16), "sp2": jnp.asarray(sp2, bf16),
        "sc3": jnp.asarray(sc3, bf16),
        "w1": _wcat(params["w1"], CP, CP),     # input & output padded to 128
        "w2": _wcat(params["w2"], CP, C2),
        "w3": _wcat(params["w3"], C2, C3),     # (1152, 256)  -- async DMA
        "w4": _wcat(params["w4"], C3, C4),     # (256, 512)   -- async DMA
        "wfc": jnp.asarray(wfc, bf16),         # (1024, 128)  -- async DMA
        "bfc": jnp.asarray(bfc, jnp.float32),
        "pbn": jnp.asarray(pbn, jnp.float32),
    }


# ------------------------------ forward wrapper -------------------------------

def dqn_forward(prep, x_nchw):
    B, C, H, W = x_nchw.shape
    assert (B, H, W) == (prep["B"], prep["H"], prep["W"]) and C == prep["cin"]
    bf16 = jnp.bfloat16

    # Boundary layout prep only: NCHW -> rows=(b,h,w) x lanes=C, pad C to 128.
    x2d = jnp.transpose(x_nchw, (0, 2, 3, 1)).reshape(B * H * W, C).astype(bf16)
    x2d = jnp.pad(x2d, ((0, 0), (0, prep["cp"] - C)))

    cp_, c2, c3, c4 = prep["cp"], prep["c2"], prep["c3"], prep["c4"]
    m1, m1p, t1 = prep["m1"], prep["m1p"], prep["t1"]
    q1, q1p = prep["q1"], prep["q1p"]
    m2, m2p, t2 = prep["m2"], prep["m2p"], prep["t2"]
    q2, q2p = prep["q2"], prep["q2p"]
    m3, m3p, t3 = prep["m3"], prep["m3p"], prep["t3"]
    S, npad = prep["S"], prep["npad"]

    def kernel(x_ref, sc1_ref, sp1_ref, sc2_ref, sp2_ref, sc3_ref,
               w1_ref, w2_ref, pbn_ref, bfc_ref,
               w3_hbm, w4_hbm, wfc_hbm,
               o_ref,
               w3_buf, w4_buf, wfc_buf, dma_sem):
        f32 = jnp.float32

        # Kick off the big late-layer weight DMAs so they overlap early compute.
        cp3 = pltpu.make_async_copy(w3_hbm, w3_buf, dma_sem.at[0]); cp3.start()
        cp4 = pltpu.make_async_copy(w4_hbm, w4_buf, dma_sem.at[1]); cp4.start()
        cpf = pltpu.make_async_copy(wfc_hbm, wfc_buf, dma_sem.at[2]); cpf.start()

        def conv_bn(inp_bf, sel_ref, wcat, taps, m_out, m_pad, layer, cout, relu):
            # One stacked 0/1 gather matmul (exact row copies / exact zeros for
            # conv zero-padding), 128-lane-aligned concat of the tap blocks,
            # then ONE wide-K MXU matmul against the K-concatenated weight.
            # Conv bias is dropped (cancelled by training-mode BN mean-sub).
            if sel_ref is None:                                    # 1x1 conv
                cols = inp_bf
            else:
                g = jnp.dot(sel_ref[...], inp_bf, preferred_element_type=f32)
                blocks = [g[t * m_pad:t * m_pad + m_out, :] for t in range(taps)]
                cols = blocks[0] if taps == 1 else jnp.concatenate(blocks, axis=1)
                cols = cols.astype(jnp.bfloat16)    # exact (values are bf16)
            z = jnp.dot(cols, wcat, preferred_element_type=f32)
            gamma = pbn_ref[2 * layer:2 * layer + 1, 0:cout]
            beta = pbn_ref[2 * layer + 1:2 * layer + 2, 0:cout]
            inv_n = 1.0 / z.shape[0]
            mean = jnp.sum(z, axis=0, keepdims=True) * inv_n
            var = jnp.sum(z * z, axis=0, keepdims=True) * inv_n - mean * mean
            scale = gamma * lax.rsqrt(var + EPS)
            shift = beta - mean * scale
            y = z * scale + shift
            return jnp.maximum(y, 0.0) if relu else y

        def pool_relu(z_f32, selp_ref, m_out, m_pad):
            # relu(maxpool_{-inf pad}(u)) == max over taps of the zero-padded
            # gather of relu(u): one stacked gather matmul + 3 VPU maxes.
            y = jnp.maximum(z_f32, 0.0).astype(jnp.bfloat16)
            g = jnp.dot(selp_ref[...], y, preferred_element_type=f32)
            out = g[0:m_out, :]
            for t in range(1, 4):
                out = jnp.maximum(out, g[t * m_pad:t * m_pad + m_out, :])
            return out.astype(jnp.bfloat16)

        x = x_ref[...]                                           # (B*H*W, 128)

        z = conv_bn(x, sc1_ref, w1_ref[...], t1, m1, m1p, 0, cp_, relu=False)
        y = pool_relu(z, sp1_ref, q1, q1p)                        # (q1, 128)

        z = conv_bn(y, sc2_ref, w2_ref[...], t2, m2, m2p, 1, c2, relu=False)
        y = pool_relu(z, sp2_ref, q2, q2p)                        # (q2, 128)

        cp3.wait()
        z = conv_bn(y, sc3_ref, w3_buf[...], t3, m3, m3p, 2, c3, relu=True)
        y = z.astype(jnp.bfloat16)                                # (m3, 256)

        cp4.wait()
        z = conv_bn(y, None, w4_buf[...], 1, m3, m3, 3, c4, relu=True)
        y = z.astype(jnp.bfloat16)                                # (m3, 512)

        # fc1: lane-concatenate the S spatial rows of each batch element (the
        # PyTorch NCHW flatten is folded into wfc at prep time), one matmul.
        rows = []
        for b in range(B):
            blocks = [y[b * S + s:b * S + s + 1, :] for s in range(S)]
            rows.append(blocks[0] if S == 1 else jnp.concatenate(blocks, axis=1))
        fc_in = rows[0] if B == 1 else jnp.concatenate(rows, axis=0)  # (B, S*C4)
        cpf.wait()
        out = jnp.dot(fc_in, wfc_buf[...], preferred_element_type=f32)
        o_ref[...] = out + bfc_ref[...]

    vmem = pl.BlockSpec(memory_space=pltpu.MemorySpace.VMEM)
    anyspace = pl.BlockSpec(memory_space=pl.ANY)
    args = (x2d, prep["sc1"], prep["sp1"], prep["sc2"], prep["sp2"], prep["sc3"],
            prep["w1"], prep["w2"], prep["pbn"], prep["bfc"],
            prep["w3"], prep["w4"], prep["wfc"])

    out = pl.pallas_call(
        kernel,
        out_shape=jax.ShapeDtypeStruct((B, npad), jnp.float32),
        in_specs=[vmem] * 10 + [anyspace] * 3,
        out_specs=vmem,
        scratch_shapes=[
            pltpu.VMEM(prep["w3"].shape, jnp.bfloat16),
            pltpu.VMEM(prep["w4"].shape, jnp.bfloat16),
            pltpu.VMEM(prep["wfc"].shape, jnp.bfloat16),
            pltpu.SemaphoreType.DMA((3,)),
        ],
        cost_estimate=pl.CostEstimate(flops=10_000_000, transcendentals=4096,
                                      bytes_accessed=1_700_000),
    )(*args)
    return out[:, :prep["outputs"]]


# ------------------------- pure-JAX reference (check) -------------------------
# Mirrors the PyTorch forward with the same numerical policy as the kernel:
# bf16 conv/matmul inputs, f32 accumulation, f32 training-mode BatchNorm.

def ref_forward(params, x_nchw):
    bf16, f32 = jnp.bfloat16, jnp.float32

    def conv(x, w, b, stride, pad):
        y = lax.conv_general_dilated(
            x.astype(bf16), w.astype(bf16), (stride, stride),
            [(pad, pad), (pad, pad)],
            dimension_numbers=("NCHW", "OIHW", "NCHW"),
            preferred_element_type=f32)
        return y + b.reshape(1, -1, 1, 1)

    def bn(x, g, bta):
        mean = jnp.mean(x, axis=(0, 2, 3), keepdims=True)
        var = jnp.mean((x - mean) ** 2, axis=(0, 2, 3), keepdims=True)
        return ((x - mean) * lax.rsqrt(var + EPS) * g.reshape(1, -1, 1, 1)
                + bta.reshape(1, -1, 1, 1))

    def pool(x):
        return lax.reduce_window(x, -jnp.inf, lax.max, (1, 1, 2, 2),
                                 (1, 1, 1, 1),
                                 [(0, 0), (0, 0), (1, 1), (1, 1)])

    x = x_nchw.astype(f32)
    x = jax.nn.relu(pool(bn(conv(x, params["w1"], params["b1"], 2, 1),
                            params["g1"], params["bb1"])))
    x = jax.nn.relu(pool(bn(conv(x, params["w2"], params["b2"], 2, 1),
                            params["g2"], params["bb2"])))
    x = jax.nn.relu(bn(conv(x, params["w3"], params["b3"], 2, 0),
                       params["g3"], params["bb3"]))
    x = jax.nn.relu(bn(conv(x, params["w4"], params["b4"], 1, 0),
                       params["g4"], params["bb4"]))
    x = x.reshape(x.shape[0], -1)
    return (jnp.dot(x.astype(bf16), params["wfc"].astype(bf16),
                    preferred_element_type=f32) + params["bfc"])


# -------------------------------- parameters ----------------------------------

def init_params(key, outputs):
    ks = jax.random.split(key, 18)

    def nrm(k, shape, scale=0.1):
        return scale * jax.random.normal(k, shape, jnp.float32)

    # wfc is stored as (in_features, out_features) == fc1.weight.T
    return {
        "w1": nrm(ks[0], (64, 32, 2, 2)),    "b1": nrm(ks[1], (64,)),
        "g1": 1.0 + nrm(ks[2], (64,)),       "bb1": nrm(ks[3], (64,)),
        "w2": nrm(ks[4], (128, 64, 2, 2)),   "b2": nrm(ks[5], (128,)),
        "g2": 1.0 + nrm(ks[6], (128,)),      "bb2": nrm(ks[7], (128,)),
        "w3": nrm(ks[8], (256, 128, 3, 3)),  "b3": nrm(ks[9], (256,)),
        "g3": 1.0 + nrm(ks[10], (256,)),     "bb3": nrm(ks[11], (256,)),
        "w4": nrm(ks[12], (512, 256, 1, 1)), "b4": nrm(ks[13], (512,)),
        "g4": 1.0 + nrm(ks[14], (512,)),     "bb4": nrm(ks[15], (512,)),
        "wfc": nrm(ks[16], (1024, outputs)), "bfc": nrm(ks[17], (outputs,)),
    }


if __name__ == "__main__":
    key = jax.random.PRNGKey(0)
    outputs = 10
    params = init_params(jax.random.fold_in(key, 1), outputs)

    # NCHW input; spatial (8, 4) => flattened conv4 features 512*2*1 = 1024.
    x = jax.random.normal(jax.random.fold_in(key, 2), (2, 32, 8, 4), jnp.float32)

    prep = prepare_dqn(params, B=2, H=8, W=4)
    out = jax.block_until_ready(dqn_forward(prep, x))
    ref = jax.block_until_ready(ref_forward(params, x))

    assert out.shape == (2, outputs), out.shape
    err = float(jnp.max(jnp.abs(out - ref)))
    # Both paths use bf16 MXU inputs with f32 accumulation; remaining
    # differences come from f32 accumulation order / single-pass BN variance
    # occasionally flipping a bf16 rounding boundary (each flip perturbs the
    # ~O(2) outputs by <~0.01).  Structural bugs would show up as errors >= 0.1.
    assert err < 5e-2, f"max abs err {err}"
    print("KERNEL_OK")
</pallas_src>

<mosaic_0001>
module attributes {stable_mosaic.version = 11 : i64} {
  func.func @kernel(%arg0: memref<64x128xbf16, #tpu.memory_space<vmem>>, %arg1: memref<128x64xbf16, #tpu.memory_space<vmem>>, %arg2: memref<192x30xbf16, #tpu.memory_space<vmem>>, %arg3: memref<96x48xbf16, #tpu.memory_space<vmem>>, %arg4: memref<160x24xbf16, #tpu.memory_space<vmem>>, %arg5: memref<72x40xbf16, #tpu.memory_space<vmem>>, %arg6: memref<512x128xbf16, #tpu.memory_space<vmem>>, %arg7: memref<512x128xbf16, #tpu.memory_space<vmem>>, %arg8: memref<8x512xf32, #tpu.memory_space<vmem>>, %arg9: memref<1x128xf32, #tpu.memory_space<vmem>>, %arg10: memref<1152x256xbf16, #tpu.memory_space<any>>, %arg11: memref<256x512xbf16, #tpu.memory_space<any>>, %arg12: memref<1024x128xbf16, #tpu.memory_space<any>>, %arg13: memref<2x128xf32, #tpu.memory_space<vmem>>, %arg14: memref<1152x256xbf16, #tpu.memory_space<vmem>>, %arg15: memref<256x512xbf16, #tpu.memory_space<vmem>>, %arg16: memref<1024x128xbf16, #tpu.memory_space<vmem>>, %arg17: memref<3x!tpu.dma_semaphore, #tpu.memory_space<semaphore_mem>>) attributes {dimension_semantics = [], scalar_prefetch = 0 : i64, scratch_operands = 4 : i64, tpu.core_type = #tpu.core_type<tc>} {
    %c0_i32 = arith.constant 0 : i32
    %0 = tpu.memref_slice %arg17[%c0_i32] : memref<3x!tpu.dma_semaphore, #tpu.memory_space<semaphore_mem>> -> memref<1x!tpu.dma_semaphore, #tpu.memory_space<semaphore_mem>>
    %1 = tpu.memref_squeeze %0 : memref<1x!tpu.dma_semaphore, #tpu.memory_space<semaphore_mem>> -> memref<!tpu.dma_semaphore, #tpu.memory_space<semaphore_mem>>
    tpu.enqueue_dma source(%arg10 : memref<1152x256xbf16, #tpu.memory_space<any>>) target(%arg14 : memref<1152x256xbf16, #tpu.memory_space<vmem>>) target_semaphore(%1 : memref<!tpu.dma_semaphore, #tpu.memory_space<semaphore_mem>>)
    %c1_i32 = arith.constant 1 : i32
    %2 = tpu.memref_slice %arg17[%c1_i32] : memref<3x!tpu.dma_semaphore, #tpu.memory_space<semaphore_mem>> -> memref<1x!tpu.dma_semaphore, #tpu.memory_space<semaphore_mem>>
    %3 = tpu.memref_squeeze %2 : memref<1x!tpu.dma_semaphore, #tpu.memory_space<semaphore_mem>> -> memref<!tpu.dma_semaphore, #tpu.memory_space<semaphore_mem>>
    tpu.enqueue_dma source(%arg11 : memref<256x512xbf16, #tpu.memory_space<any>>) target(%arg15 : memref<256x512xbf16, #tpu.memory_space<vmem>>) target_semaphore(%3 : memref<!tpu.dma_semaphore, #tpu.memory_space<semaphore_mem>>)
    %c2_i32 = arith.constant 2 : i32
    %4 = tpu.memref_slice %arg17[%c2_i32] : memref<3x!tpu.dma_semaphore, #tpu.memory_space<semaphore_mem>> -> memref<1x!tpu.dma_semaphore, #tpu.memory_space<semaphore_mem>>
    %5 = tpu.memref_squeeze %4 : memref<1x!tpu.dma_semaphore, #tpu.memory_space<semaphore_mem>> -> memref<!tpu.dma_semaphore, #tpu.memory_space<semaphore_mem>>
    tpu.enqueue_dma source(%arg12 : memref<1024x128xbf16, #tpu.memory_space<any>>) target(%arg16 : memref<1024x128xbf16, #tpu.memory_space<vmem>>) target_semaphore(%5 : memref<!tpu.dma_semaphore, #tpu.memory_space<semaphore_mem>>)
    %c0 = arith.constant 0 : index
    %c0_0 = arith.constant 0 : index
    %6 = vector.load %arg0[%c0, %c0_0] : memref<64x128xbf16, #tpu.memory_space<vmem>>, vector<64x128xbf16>
    %c0_1 = arith.constant 0 : index
    %c0_2 = arith.constant 0 : index
    %7 = vector.load %arg6[%c0_1, %c0_2] : memref<512x128xbf16, #tpu.memory_space<vmem>>, vector<512x128xbf16>
    %c0_3 = arith.constant 0 : index
    %c0_4 = arith.constant 0 : index
    %8 = vector.load %arg1[%c0_3, %c0_4] : memref<128x64xbf16, #tpu.memory_space<vmem>>, vector<128x64xbf16>
    %cst = arith.constant dense<0.000000e+00> : vector<128x128xf32>
    %9 = tpu.matmul %8, %6, %cst {dimension_numbers = #tpu.dot_dimension_numbers<[1], [0], [0], [1], [0, 0, 1, 1], [], []>} : vector<128x64xbf16>, vector<64x128xbf16>, vector<128x128xf32> -> vector<128x128xf32>
    %10 = vector.extract_strided_slice %9 {offsets = [0, 0], sizes = [30, 128], strides = [1, 1]} : vector<128x128xf32> to vector<30x128xf32>
    %11 = vector.extract_strided_slice %9 {offsets = [32, 0], sizes = [30, 128], strides = [1, 1]} : vector<128x128xf32> to vector<30x128xf32>
    %12 = vector.extract_strided_slice %9 {offsets = [64, 0], sizes = [30, 128], strides = [1, 1]} : vector<128x128xf32> to vector<30x128xf32>
    %13 = vector.extract_strided_slice %9 {offsets = [96, 0], sizes = [30, 128], strides = [1, 1]} : vector<128x128xf32> to vector<30x128xf32>
    %14 = tpu.concatenate %10, %11, %12, %13 in 1 : vector<30x128xf32>, vector<30x128xf32>, vector<30x128xf32>, vector<30x128xf32> -> vector<30x512xf32>
    %15 = arith.truncf %14 : vector<30x512xf32> to vector<30x512xbf16>
    %cst_5 = arith.constant dense<0.000000e+00> : vector<30x128xf32>
    %16 = tpu.matmul %15, %7, %cst_5 {dimension_numbers = #tpu.dot_dimension_numbers<[1], [0], [0], [1], [0, 0, 1, 1], [], []>} : vector<30x512xbf16>, vector<512x128xbf16>, vector<30x128xf32> -> vector<30x128xf32>
    %c0_6 = arith.constant 0 : index
    %c0_7 = arith.constant 0 : index
    %17 = vector.load %arg8[%c0_6, %c0_7] : memref<8x512xf32, #tpu.memory_space<vmem>>, vector<1x128xf32>
    %c1 = arith.constant 1 : index
    %c0_8 = arith.constant 0 : index
    %18 = vector.load %arg8[%c1, %c0_8] : memref<8x512xf32, #tpu.memory_space<vmem>>, vector<1x128xf32>
    %cst_9 = arith.constant dense<0.000000e+00> : vector<128xf32>
    %19 = vector.multi_reduction <add>, %16, %cst_9 [0] : vector<30x128xf32> to vector<128xf32>
    %20 = vector.shape_cast %19 : vector<128xf32> to vector<1x128xf32>
    %cst_10 = arith.constant 0.0333333351 : f32
    %21 = vector.broadcast %cst_10 : f32 to vector<1x128xf32>
    %22 = arith.mulf %20, %21 : vector<1x128xf32>
    %23 = arith.mulf %16, %16 : vector<30x128xf32>
    %cst_11 = arith.constant dense<0.000000e+00> : vector<128xf32>
    %24 = vector.multi_reduction <add>, %23, %cst_11 [0] : vector<30x128xf32> to vector<128xf32>
    %25 = vector.shape_cast %24 : vector<128xf32> to vector<1x128xf32>
    %cst_12 = arith.constant 0.0333333351 : f32
    %26 = vector.broadcast %cst_12 : f32 to vector<1x128xf32>
    %27 = arith.mulf %25, %26 : vector<1x128xf32>
    %28 = arith.mulf %22, %22 : vector<1x128xf32>
    %29 = arith.subf %27, %28 : vector<1x128xf32>
    %cst_13 = arith.constant 9.99999974E-6 : f32
    %30 = vector.broadcast %cst_13 : f32 to vector<1x128xf32>
    %31 = arith.addf %29, %30 : vector<1x128xf32>
    %32 = math.rsqrt %31 : vector<1x128xf32>
    %33 = arith.mulf %17, %32 : vector<1x128xf32>
    %34 = arith.mulf %22, %33 : vector<1x128xf32>
    %35 = arith.subf %18, %34 : vector<1x128xf32>
    %36 = vector.broadcast %33 : vector<1x128xf32> to vector<30x128xf32>
    %37 = arith.mulf %16, %36 : vector<30x128xf32>
    %38 = vector.broadcast %35 : vector<1x128xf32> to vector<30x128xf32>
    %39 = arith.addf %37, %38 : vector<30x128xf32>
    %cst_14 = arith.constant 0.000000e+00 : f32
    %40 = vector.broadcast %cst_14 : f32 to vector<30x128xf32>
    %41 = arith.maximumf %39, %40 : vector<30x128xf32>
    %42 = arith.truncf %41 : vector<30x128xf32> to vector<30x128xbf16>
    %c0_15 = arith.constant 0 : index
    %c0_16 = arith.constant 0 : index
    %43 = vector.load %arg2[%c0_15, %c0_16] : memref<192x30xbf16, #tpu.memory_space<vmem>>, vector<192x30xbf16>
    %cst_17 = arith.constant dense<0.000000e+00> : vector<192x128xf32>
    %44 = tpu.matmul %43, %42, %cst_17 {dimension_numbers = #tpu.dot_dimension_numbers<[1], [0], [0], [1], [0, 0, 1, 1], [], []>} : vector<192x30xbf16>, vector<30x128xbf16>, vector<192x128xf32> -> vector<192x128xf32>
    %45 = vector.extract_strided_slice %44 {offsets = [0, 0], sizes = [48, 128], strides = [1, 1]} : vector<192x128xf32> to vector<48x128xf32>
    %46 = vector.extract_strided_slice %44 {offsets = [48, 0], sizes = [48, 128], strides = [1, 1]} : vector<192x128xf32> to vector<48x128xf32>
    %47 = arith.maximumf %45, %46 : vector<48x128xf32>
    %48 = vector.extract_strided_slice %44 {offsets = [96, 0], sizes = [48, 128], strides = [1, 1]} : vector<192x128xf32> to vector<48x128xf32>
    %49 = arith.maximumf %47, %48 : vector<48x128xf32>
    %50 = vector.extract_strided_slice %44 {offsets = [144, 0], sizes = [48, 128], strides = [1, 1]} : vector<192x128xf32> to vector<48x128xf32>
    %51 = arith.maximumf %49, %50 : vector<48x128xf32>
    %52 = arith.truncf %51 : vector<48x128xf32> to vector<48x128xbf16>
    %c0_18 = arith.constant 0 : index
    %c0_19 = arith.constant 0 : index
    %53 = vector.load %arg7[%c0_18, %c0_19] : memref<512x128xbf16, #tpu.memory_space<vmem>>, vector<512x128xbf16>
    %c0_20 = arith.constant 0 : index
    %c0_21 = arith.constant 0 : index
    %54 = vector.load %arg3[%c0_20, %c0_21] : memref<96x48xbf16, #tpu.memory_space<vmem>>, vector<96x48xbf16>
    %cst_22 = arith.constant dense<0.000000e+00> : vector<96x128xf32>
    %55 = tpu.matmul %54, %52, %cst_22 {dimension_numbers = #tpu.dot_dimension_numbers<[1], [0], [0], [1], [0, 0, 1, 1], [], []>} : vector<96x48xbf16>, vector<48x128xbf16>, vector<96x128xf32> -> vector<96x128xf32>
    %56 = vector.extract_strided_slice %55 {offsets = [0, 0], sizes = [24, 128], strides = [1, 1]} : vector<96x128xf32> to vector<24x128xf32>
    %57 = vector.extract_strided_slice %55 {offsets = [24, 0], sizes = [24, 128], strides = [1, 1]} : vector<96x128xf32> to vector<24x128xf32>
    %58 = vector.extract_strided_slice %55 {offsets = [48, 0], sizes = [24, 128], strides = [1, 1]} : vector<96x128xf32> to vector<24x128xf32>
    %59 = vector.extract_strided_slice %55 {offsets = [72, 0], sizes = [24, 128], strides = [1, 1]} : vector<96x128xf32> to vector<24x128xf32>
    %60 = tpu.concatenate %56, %57, %58, %59 in 1 : vector<24x128xf32>, vector<24x128xf32>, vector<24x128xf32>, vector<24x128xf32> -> vector<24x512xf32>
    %61 = arith.truncf %60 : vector<24x512xf32> to vector<24x512xbf16>
    %cst_23 = arith.constant dense<0.000000e+00> : vector<24x128xf32>
    %62 = tpu.matmul %61, %53, %cst_23 {dimension_numbers = #tpu.dot_dimension_numbers<[1], [0], [0], [1], [0, 0, 1, 1], [], []>} : vector<24x512xbf16>, vector<512x128xbf16>, vector<24x128xf32> -> vector<24x128xf32>
    %c2 = arith.constant 2 : index
    %c0_24 = arith.constant 0 : index
    %63 = vector.load %arg8[%c2, %c0_24] : memref<8x512xf32, #tpu.memory_space<vmem>>, vector<1x128xf32>
    %c3 = arith.constant 3 : index
    %c0_25 = arith.constant 0 : index
    %64 = vector.load %arg8[%c3, %c0_25] : memref<8x512xf32, #tpu.memory_space<vmem>>, vector<1x128xf32>
    %cst_26 = arith.constant dense<0.000000e+00> : vector<128xf32>
    %65 = vector.multi_reduction <add>, %62, %cst_26 [0] : vector<24x128xf32> to vector<128xf32>
    %66 = vector.shape_cast %65 : vector<128xf32> to vector<1x128xf32>
    %cst_27 = arith.constant 0.0416666679 : f32
    %67 = vector.broadcast %cst_27 : f32 to vector<1x128xf32>
    %68 = arith.mulf %66, %67 : vector<1x128xf32>
    %69 = arith.mulf %62, %62 : vector<24x128xf32>
    %cst_28 = arith.constant dense<0.000000e+00> : vector<128xf32>
    %70 = vector.multi_reduction <add>, %69, %cst_28 [0] : vector<24x128xf32> to vector<128xf32>
    %71 = vector.shape_cast %70 : vector<128xf32> to vector<1x128xf32>
    %cst_29 = arith.constant 0.0416666679 : f32
    %72 = vector.broadcast %cst_29 : f32 to vector<1x128xf32>
    %73 = arith.mulf %71, %72 : vector<1x128xf32>
    %74 = arith.mulf %68, %68 : vector<1x128xf32>
    %75 = arith.subf %73, %74 : vector<1x128xf32>
    %cst_30 = arith.constant 9.99999974E-6 : f32
    %76 = vector.broadcast %cst_30 : f32 to vector<1x128xf32>
    %77 = arith.addf %75, %76 : vector<1x128xf32>
    %78 = math.rsqrt %77 : vector<1x128xf32>
    %79 = arith.mulf %63, %78 : vector<1x128xf32>
    %80 = arith.mulf %68, %79 : vector<1x128xf32>
    %81 = arith.subf %64, %80 : vector<1x128xf32>
    %82 = vector.broadcast %79 : vector<1x128xf32> to vector<24x128xf32>
    %83 = arith.mulf %62, %82 : vector<24x128xf32>
    %84 = vector.broadcast %81 : vector<1x128xf32> to vector<24x128xf32>
    %85 = arith.addf %83, %84 : vector<24x128xf32>
    %cst_31 = arith.constant 0.000000e+00 : f32
    %86 = vector.broadcast %cst_31 : f32 to vector<24x128xf32>
    %87 = arith.maximumf %85, %86 : vector<24x128xf32>
    %88 = arith.truncf %87 : vector<24x128xf32> to vector<24x128xbf16>
    %c0_32 = arith.constant 0 : index
    %c0_33 = arith.constant 0 : index
    %89 = vector.load %arg4[%c0_32, %c0_33] : memref<160x24xbf16, #tpu.memory_space<vmem>>, vector<160x24xbf16>
    %cst_34 = arith.constant dense<0.000000e+00> : vector<160x128xf32>
    %90 = tpu.matmul %89, %88, %cst_34 {dimension_numbers = #tpu.dot_dimension_numbers<[1], [0], [0], [1], [0, 0, 1, 1], [], []>} : vector<160x24xbf16>, vector<24x128xbf16>, vector<160x128xf32> -> vector<160x128xf32>
    %91 = vector.extract_strided_slice %90 {offsets = [0, 0], sizes = [40, 128], strides = [1, 1]} : vector<160x128xf32> to vector<40x128xf32>
    %92 = vector.extract_strided_slice %90 {offsets = [40, 0], sizes = [40, 128], strides = [1, 1]} : vector<160x128xf32> to vector<40x128xf32>
    %93 = arith.maximumf %91, %92 : vector<40x128xf32>
    %94 = vector.extract_strided_slice %90 {offsets = [80, 0], sizes = [40, 128], strides = [1, 1]} : vector<160x128xf32> to vector<40x128xf32>
    %95 = arith.maximumf %93, %94 : vector<40x128xf32>
    %96 = vector.extract_strided_slice %90 {offsets = [120, 0], sizes = [40, 128], strides = [1, 1]} : vector<160x128xf32> to vector<40x128xf32>
    %97 = arith.maximumf %95, %96 : vector<40x128xf32>
    %98 = arith.truncf %97 : vector<40x128xf32> to vector<40x128xbf16>
    %c0_i32_35 = arith.constant 0 : i32
    %99 = tpu.memref_slice %arg17[%c0_i32_35] : memref<3x!tpu.dma_semaphore, #tpu.memory_space<semaphore_mem>> -> memref<1x!tpu.dma_semaphore, #tpu.memory_space<semaphore_mem>>
    %100 = tpu.memref_squeeze %99 : memref<1x!tpu.dma_semaphore, #tpu.memory_space<semaphore_mem>> -> memref<!tpu.dma_semaphore, #tpu.memory_space<semaphore_mem>>
    tpu.wait_dma2 semaphore(%100 : memref<!tpu.dma_semaphore, #tpu.memory_space<semaphore_mem>>) src(%arg10 : memref<1152x256xbf16, #tpu.memory_space<any>>) dst(%arg14 : memref<1152x256xbf16, #tpu.memory_space<vmem>>)
    %c0_36 = arith.constant 0 : index
    %c0_37 = arith.constant 0 : index
    %101 = vector.load %arg14[%c0_36, %c0_37] : memref<1152x256xbf16, #tpu.memory_space<vmem>>, vector<1152x256xbf16>
    %c0_38 = arith.constant 0 : index
    %c0_39 = arith.constant 0 : index
    %102 = vector.load %arg5[%c0_38, %c0_39] : memref<72x40xbf16, #tpu.memory_space<vmem>>, vector<72x40xbf16>
    %cst_40 = arith.constant dense<0.000000e+00> : vector<72x128xf32>
    %103 = tpu.matmul %102, %98, %cst_40 {dimension_numbers = #tpu.dot_dimension_numbers<[1], [0], [0], [1], [0, 0, 1, 1], [], []>} : vector<72x40xbf16>, vector<40x128xbf16>, vector<72x128xf32> -> vector<72x128xf32>
    %104 = vector.extract_strided_slice %103 {offsets = [0, 0], sizes = [4, 128], strides = [1, 1]} : vector<72x128xf32> to vector<4x128xf32>
    %105 = vector.extract_strided_slice %103 {offsets = [8, 0], sizes = [4, 128], strides = [1, 1]} : vector<72x128xf32> to vector<4x128xf32>
    %106 = vector.extract_strided_slice %103 {offsets = [16, 0], sizes = [4, 128], strides = [1, 1]} : vector<72x128xf32> to vector<4x128xf32>
    %107 = vector.extract_strided_slice %103 {offsets = [24, 0], sizes = [4, 128], strides = [1, 1]} : vector<72x128xf32> to vector<4x128xf32>
    %108 = vector.extract_strided_slice %103 {offsets = [32, 0], sizes = [4, 128], strides = [1, 1]} : vector<72x128xf32> to vector<4x128xf32>
    %109 = vector.extract_strided_slice %103 {offsets = [40, 0], sizes = [4, 128], strides = [1, 1]} : vector<72x128xf32> to vector<4x128xf32>
    %110 = vector.extract_strided_slice %103 {offsets = [48, 0], sizes = [4, 128], strides = [1, 1]} : vector<72x128xf32> to vector<4x128xf32>
    %111 = vector.extract_strided_slice %103 {offsets = [56, 0], sizes = [4, 128], strides = [1, 1]} : vector<72x128xf32> to vector<4x128xf32>
    %112 = vector.extract_strided_slice %103 {offsets = [64, 0], sizes = [4, 128], strides = [1, 1]} : vector<72x128xf32> to vector<4x128xf32>
    %113 = tpu.concatenate %104, %105, %106, %107, %108, %109, %110, %111, %112 in 1 : vector<4x128xf32>, vector<4x128xf32>, vector<4x128xf32>, vector<4x128xf32>, vector<4x128xf32>, vector<4x128xf32>, vector<4x128xf32>, vector<4x128xf32>, vector<4x128xf32> -> vector<4x1152xf32>
    %114 = arith.truncf %113 : vector<4x1152xf32> to vector<4x1152xbf16>
    %cst_41 = arith.constant dense<0.000000e+00> : vector<4x256xf32>
    %115 = tpu.matmul %114, %101, %cst_41 {dimension_numbers = #tpu.dot_dimension_numbers<[1], [0], [0], [1], [0, 0, 1, 1], [], []>} : vector<4x1152xbf16>, vector<1152x256xbf16>, vector<4x256xf32> -> vector<4x256xf32>
    %c4 = arith.constant 4 : index
    %c0_42 = arith.constant 0 : index
    %116 = vector.load %arg8[%c4, %c0_42] : memref<8x512xf32, #tpu.memory_space<vmem>>, vector<1x256xf32>
    %c5 = arith.constant 5 : index
    %c0_43 = arith.constant 0 : index
    %117 = vector.load %arg8[%c5, %c0_43] : memref<8x512xf32, #tpu.memory_space<vmem>>, vector<1x256xf32>
    %cst_44 = arith.constant dense<0.000000e+00> : vector<256xf32>
    %118 = vector.multi_reduction <add>, %115, %cst_44 [0] : vector<4x256xf32> to vector<256xf32>
    %119 = vector.shape_cast %118 : vector<256xf32> to vector<1x256xf32>
    %cst_45 = arith.constant 2.500000e-01 : f32
    %120 = vector.broadcast %cst_45 : f32 to vector<1x256xf32>
    %121 = arith.mulf %119, %120 : vector<1x256xf32>
    %122 = arith.mulf %115, %115 : vector<4x256xf32>
    %cst_46 = arith.constant dense<0.000000e+00> : vector<256xf32>
    %123 = vector.multi_reduction <add>, %122, %cst_46 [0] : vector<4x256xf32> to vector<256xf32>
    %124 = vector.shape_cast %123 : vector<256xf32> to vector<1x256xf32>
    %cst_47 = arith.constant 2.500000e-01 : f32
    %125 = vector.broadcast %cst_47 : f32 to vector<1x256xf32>
    %126 = arith.mulf %124, %125 : vector<1x256xf32>
    %127 = arith.mulf %121, %121 : vector<1x256xf32>
    %128 = arith.subf %126, %127 : vector<1x256xf32>
    %cst_48 = arith.constant 9.99999974E-6 : f32
    %129 = vector.broadcast %cst_48 : f32 to vector<1x256xf32>
    %130 = arith.addf %128, %129 : vector<1x256xf32>
    %131 = math.rsqrt %130 : vector<1x256xf32>
    %132 = arith.mulf %116, %131 : vector<1x256xf32>
    %133 = arith.mulf %121, %132 : vector<1x256xf32>
    %134 = arith.subf %117, %133 : vector<1x256xf32>
    %135 = vector.broadcast %132 : vector<1x256xf32> to vector<4x256xf32>
    %136 = arith.mulf %115, %135 : vector<4x256xf32>
    %137 = vector.broadcast %134 : vector<1x256xf32> to vector<4x256xf32>
    %138 = arith.addf %136, %137 : vector<4x256xf32>
    %cst_49 = arith.constant 0.000000e+00 : f32
    %139 = vector.broadcast %cst_49 : f32 to vector<4x256xf32>
    %140 = arith.maximumf %138, %139 : vector<4x256xf32>
    %141 = arith.truncf %140 : vector<4x256xf32> to vector<4x256xbf16>
    %c1_i32_50 = arith.constant 1 : i32
    %142 = tpu.memref_slice %arg17[%c1_i32_50] : memref<3x!tpu.dma_semaphore, #tpu.memory_space<semaphore_mem>> -> memref<1x!tpu.dma_semaphore, #tpu.memory_space<semaphore_mem>>
    %143 = tpu.memref_squeeze %142 : memref<1x!tpu.dma_semaphore, #tpu.memory_space<semaphore_mem>> -> memref<!tpu.dma_semaphore, #tpu.memory_space<semaphore_mem>>
    tpu.wait_dma2 semaphore(%143 : memref<!tpu.dma_semaphore, #tpu.memory_space<semaphore_mem>>) src(%arg11 : memref<256x512xbf16, #tpu.memory_space<any>>) dst(%arg15 : memref<256x512xbf16, #tpu.memory_space<vmem>>)
    %c0_51 = arith.constant 0 : index
    %c0_52 = arith.constant 0 : index
    %144 = vector.load %arg15[%c0_51, %c0_52] : memref<256x512xbf16, #tpu.memory_space<vmem>>, vector<256x512xbf16>
    %cst_53 = arith.constant dense<0.000000e+00> : vector<4x512xf32>
    %145 = tpu.matmul %141, %144, %cst_53 {dimension_numbers = #tpu.dot_dimension_numbers<[1], [0], [0], [1], [0, 0, 1, 1], [], []>} : vector<4x256xbf16>, vector<256x512xbf16>, vector<4x512xf32> -> vector<4x512xf32>
    %c6 = arith.constant 6 : index
    %c0_54 = arith.constant 0 : index
    %146 = vector.load %arg8[%c6, %c0_54] : memref<8x512xf32, #tpu.memory_space<vmem>>, vector<1x512xf32>
    %c7 = arith.constant 7 : index
    %c0_55 = arith.constant 0 : index
    %147 = vector.load %arg8[%c7, %c0_55] : memref<8x512xf32, #tpu.memory_space<vmem>>, vector<1x512xf32>
    %cst_56 = arith.constant dense<0.000000e+00> : vector<512xf32>
    %148 = vector.multi_reduction <add>, %145, %cst_56 [0] : vector<4x512xf32> to vector<512xf32>
    %149 = vector.shape_cast %148 : vector<512xf32> to vector<1x512xf32>
    %cst_57 = arith.constant 2.500000e-01 : f32
    %150 = vector.broadcast %cst_57 : f32 to vector<1x512xf32>
    %151 = arith.mulf %149, %150 : vector<1x512xf32>
    %152 = arith.mulf %145, %145 : vector<4x512xf32>
    %cst_58 = arith.constant dense<0.000000e+00> : vector<512xf32>
    %153 = vector.multi_reduction <add>, %152, %cst_58 [0] : vector<4x512xf32> to vector<512xf32>
    %154 = vector.shape_cast %153 : vector<512xf32> to vector<1x512xf32>
    %cst_59 = arith.constant 2.500000e-01 : f32
    %155 = vector.broadcast %cst_59 : f32 to vector<1x512xf32>
    %156 = arith.mulf %154, %155 : vector<1x512xf32>
    %157 = arith.mulf %151, %151 : vector<1x512xf32>
    %158 = arith.subf %156, %157 : vector<1x512xf32>
    %cst_60 = arith.constant 9.99999974E-6 : f32
    %159 = vector.broadcast %cst_60 : f32 to vector<1x512xf32>
    %160 = arith.addf %158, %159 : vector<1x512xf32>
    %161 = math.rsqrt %160 : vector<1x512xf32>
    %162 = arith.mulf %146, %161 : vector<1x512xf32>
    %163 = arith.mulf %151, %162 : vector<1x512xf32>
    %164 = arith.subf %147, %163 : vector<1x512xf32>
    %165 = vector.broadcast %162 : vector<1x512xf32> to vector<4x512xf32>
    %166 = arith.mulf %145, %165 : vector<4x512xf32>
    %167 = vector.broadcast %164 : vector<1x512xf32> to vector<4x512xf32>
    %168 = arith.addf %166, %167 : vector<4x512xf32>
    %cst_61 = arith.constant 0.000000e+00 : f32
    %169 = vector.broadcast %cst_61 : f32 to vector<4x512xf32>
    %170 = arith.maximumf %168, %169 : vector<4x512xf32>
    %171 = arith.truncf %170 : vector<4x512xf32> to vector<4x512xbf16>
    %172 = vector.extract_strided_slice %171 {offsets = [0, 0], sizes = [1, 512], strides = [1, 1]} : vector<4x512xbf16> to vector<1x512xbf16>
    %173 = vector.extract_strided_slice %171 {offsets = [1, 0], sizes = [1, 512], strides = [1, 1]} : vector<4x512xbf16> to vector<1x512xbf16>
    %174 = tpu.concatenate %172, %173 in 1 : vector<1x512xbf16>, vector<1x512xbf16> -> vector<1x1024xbf16>
    %175 = vector.extract_strided_slice %171 {offsets = [2, 0], sizes = [1, 512], strides = [1, 1]} : vector<4x512xbf16> to vector<1x512xbf16>
    %176 = vector.extract_strided_slice %171 {offsets = [3, 0], sizes = [1, 512], strides = [1, 1]} : vector<4x512xbf16> to vector<1x512xbf16>
    %177 = tpu.concatenate %175, %176 in 1 : vector<1x512xbf16>, vector<1x512xbf16> -> vector<1x1024xbf16>
    %178 = tpu.concatenate %174, %177 in 0 : vector<1x1024xbf16>, vector<1x1024xbf16> -> vector<2x1024xbf16>
    %c2_i32_62 = arith.constant 2 : i32
    %179 = tpu.memref_slice %arg17[%c2_i32_62] : memref<3x!tpu.dma_semaphore, #tpu.memory_space<semaphore_mem>> -> memref<1x!tpu.dma_semaphore, #tpu.memory_space<semaphore_mem>>
    %180 = tpu.memref_squeeze %179 : memref<1x!tpu.dma_semaphore, #tpu.memory_space<semaphore_mem>> -> memref<!tpu.dma_semaphore, #tpu.memory_space<semaphore_mem>>
    tpu.wait_dma2 semaphore(%180 : memref<!tpu.dma_semaphore, #tpu.memory_space<semaphore_mem>>) src(%arg12 : memref<1024x128xbf16, #tpu.memory_space<any>>) dst(%arg16 : memref<1024x128xbf16, #tpu.memory_space<vmem>>)
    %c0_63 = arith.constant 0 : index
    %c0_64 = arith.constant 0 : index
    %181 = vector.load %arg16[%c0_63, %c0_64] : memref<1024x128xbf16, #tpu.memory_space<vmem>>, vector<1024x128xbf16>
    %cst_65 = arith.constant dense<0.000000e+00> : vector<2x128xf32>
    %182 = tpu.matmul %178, %181, %cst_65 {dimension_numbers = #tpu.dot_dimension_numbers<[1], [0], [0], [1], [0, 0, 1, 1], [], []>} : vector<2x1024xbf16>, vector<1024x128xbf16>, vector<2x128xf32> -> vector<2x128xf32>
    %c0_66 = arith.constant 0 : index
    %c0_67 = arith.constant 0 : index
    %183 = vector.load %arg9[%c0_66, %c0_67] : memref<1x128xf32, #tpu.memory_space<vmem>>, vector<1x128xf32>
    %184 = vector.broadcast %183 : vector<1x128xf32> to vector<2x128xf32>
    %185 = arith.addf %182, %184 : vector<2x128xf32>
    %c0_68 = arith.constant 0 : index
    %c0_69 = arith.constant 0 : index
    %186 = vector.load %arg13[%c0_68, %c0_69] : memref<2x128xf32, #tpu.memory_space<vmem>>, vector<2x128xf32>
    tpu.vector_store %arg13[%c0_68, %c0_69], %185 {strides = array<i32>} : memref<2x128xf32, #tpu.memory_space<vmem>>, vector<2x128xf32>,
    return
  }
}

</mosaic_0001>

<bundles_post_ra>
// kernel: tpu_custom_call.1
= control target key start
LH: loop header
LB: loop body
LE: loop exit
PB: predicated region body
PF: predicated region fallthrough
CT: control target
= control target key end

     0   :  { %18 = vsyncpa [#allocation7], 0  ;;  %s4502_s0 = inlined_call_operand.vmem [shape: bf16[64,128], index: 0, kind: input, shape index: {}]   ;;  %s4503_s1 = inlined_call_operand.vmem [shape: bf16[128,64], index: 1, kind: input, shape index: {}]   ;;  %s4504_s2 = inlined_call_operand.vmem [shape: bf16[192,30], index: 2, kind: input, shape index: {}]   ;;  %s4505_s3 = inlined_call_operand.vmem [shape: bf16[96,48], index: 3, kind: input, shape index: {}]   ;;  %s4506_s4 = inlined_call_operand.vmem [shape: bf16[160,24], index: 4, kind: input, shape index: {}]   ;;  %s4507_s5 = inlined_call_operand.vmem [shape: bf16[72,40], index: 5, kind: input, shape index: {}]   ;;  %s4508_s6 = inlined_call_operand.vmem [shape: bf16[512,128], index: 6, kind: input, shape index: {}]   ;;  %s4509_s7 = inlined_call_operand.hbm [shape: bf16[512,128], index: 7, kind: input, shape index: {}]   ;;  %s4510_s8 = inlined_call_operand.vmem [shape: f32[8,512], index: 8, kind: input, shape index: {}]   ;;  %s4511_s9 = inlined_call_operand.vmem [shape: f32[1,128], index: 9, kind: input, shape index: {}]   ;;  %s4512_s10 = inlined_call_operand.hbm [shape: bf16[1152,256], index: 10, kind: input, shape index: {}]   ;;  %s4513_s11 = inlined_call_operand.hbm [shape: bf16[256,512], index: 11, kind: input, shape index: {}]   ;;  %s4514_s12 = inlined_call_operand.hbm [shape: bf16[1024,128], index: 12, kind: input, shape index: {}]   ;;  %s4515_s13 = inlined_call_operand.hbm [shape: f32[2,128], index: 13, kind: output, shape index: {}]  }
   0x1   :  { %19 = vsyncpa [#allocation8], 0  ;;  %s3882_s25 = smov [#allocation6]   ;;  %s3806_s29 = scalar_lea.hbm %s4509_s7, 4096 }
   0x2   :  { %s39_s26 = sshll.u32 %s3882_s25, 4  ;;  %p3807_p0 = scmp.ne.s32.totalorder %s4509_s7, %s3806_s29  ;;  %s40_s26 = int_to_ptr.vmem [resolvable:$true] %s39_s26 }
   0x3   :  { %p3810_p1 = scmp.lt.u32.totalorder %s3806_s29, %s4509_s7 }
   0x5   :  { %p3812_p2 = pnand %p3810_p1, %p3807_p0 }
   0x7   :  { %3815 = shalt.err (!%p3812_p2)
}
   0x8   :  { %s3816_s17 = scalar_lea.vmem %s40_s26, 4096  ;;  %p3821_p4 = scmp.lt.s32.totalorder %s40_s26, %s40_s26 }
   0x9   :  { %p3817_p3 = scmp.ne.s32.totalorder %s40_s26, %s3816_s17  ;;  %p3822_p5 = scmp.lt.s32.totalorder %s3816_s17, %s3816_s17 }
   0xb   :  { %p3823_p6 = por %p3822_p5, %p3821_p4 }
   0xd   :  { %p3824_p7 = pnand %p3823_p6, %p3817_p3 }
   0xf   :  { %3827 = shalt.err (!%p3824_p7)
}
  0x10   :  { %s3883_s18 = smov 64   ;;  %s3884_s19 = smov 4  }
  0x11   :  { %45 = dma.hbm_to_vmem [thread:$0]  %s4509_s7, 4096, %s40_s26, [#allocation7], %s3883_s18, %s3883_s18, %s3884_s19  }
  0x12   :  { %3872 = dma.done.wait [#allocation7], 4096  }
  0x13   :  { %3873 = vsyncadd [#allocation7], 4294963200  ;;  %s58_s22 = sld [smem:[#allocation0]]   ;;  %76 = sst [smem:[#allocation11 + $0x3]] %s3883_s18  ;;  %vm288_vm0 = vcmask 523264   ;;  %vm842_vm1 = vcmask 244736  }
  0x14   :  { %84 = sst [smem:[#allocation11 + $0x7]] %s3883_s18  ;;  %s3885_s23 = smov [#allocation2]   ;;  %vm712_vm2 = vcmask 1045504   ;;  %vm879_vm3 = vcmask 1046528   ;;  %vm1139_vm4 = vcmask 392192   ;;  %vm1646_vm5 = vcmask 195584  }
  0x15   :  { %s66_s24 = sshll.u32 %s3885_s23, 4  ;;  %86 = sst [smem:[#allocation11 + $0x8]] %s3884_s19  ;;  %vm1677_vm6 = vcmask 1043456   ;;  %s67_s24 = int_to_ptr.vmem [resolvable:$true] %s66_s24 }
  0x16   :  { %s3886_s25 = smov 256   ;;  %s3887_s27 = smov 2  }
  0x17   :  { %70 = sst [smem:[#allocation11]] %s3886_s25  ;;  %s3888_s29 = smov 128  }
  0x18   :  { %72 = sst [smem:[#allocation11 + $0x1]] %s3886_s25  ;;  %s3889_s26 = smov [#allocation5]  }
  0x19   :  { %74 = sst [smem:[#allocation11 + $0x2]] %s3887_s27  ;;  %s3107_s28 = sshll.u32 %s58_s22, 26 }
  0x1a   :  { %78 = sst [smem:[#allocation11 + $0x4]] %s3888_s29  ;;  %s3108_s7 = sadd.s32 134217728, %s3107_s28 }
  0x1b   :  { %80 = sst [smem:[#allocation11 + $0x5]] %s3887_s27  ;;  %s3890_s30 = smov [#allocation10]  }
  0x1c   :  { %82 = sst [smem:[#allocation11 + $0x6]] %s3888_s29  ;;  %s3891_s16 = smov 512  }
  0x1d   :  { %88 = dma.general %s4512_s10, 18432, %s67_s24, %s3889_s26, %s3890_s30, [#allocation11], %s3108_s7, 0  }
  0x1e   :  { %109 = sst [smem:[#allocation13 + $0x2]] %s3884_s19  ;;  %s3892_s17 = smov [#allocation3]  }
  0x1f   :  { %105 = sst [smem:[#allocation13]] %s3891_s16  ;;  %s101_s20 = sshll.u32 %s3892_s17, 4  ;;  %s102_s20 = int_to_ptr.vmem [resolvable:$true] %s101_s20 }
  0x20   :  { %107 = sst [smem:[#allocation13 + $0x1]] %s3891_s16  ;;  %s3893_s21 = smov [#allocation5 + $0x1]  }
  0x21   :  { %111 = sst [smem:[#allocation13 + $0x3]] %s3883_s18  ;;  %s3894_s22 = smov [#allocation12]  }
  0x22   :  { %113 = sst [smem:[#allocation13 + $0x4]] %s3888_s29 }
  0x23   :  { %115 = sst [smem:[#allocation13 + $0x5]] %s3887_s27 }
  0x24   :  { %117 = sst [smem:[#allocation13 + $0x6]] %s3886_s25 }
  0x25   :  { %119 = sst [smem:[#allocation13 + $0x7]] %s3883_s18 }
  0x26   :  { %121 = sst [smem:[#allocation13 + $0x8]] %s3884_s19 }
  0x27   :  { %123 = dma.general %s4513_s11, 8192, %s102_s20, %s3893_s21, %s3894_s22, [#allocation13], %s3108_s7, 0  }
  0x28   :  { %v3681_v0 = vld [vmem:[%s4502_s0] sm:$0xff]   ;;  %v3682_v1 = vld [vmem:[%s4502_s0 + $0x8] sm:$0xff]   ;;  %v3683_v2 = vld [vmem:[%s4502_s0 + $0x10] sm:$0xff]   ;;  %s3895_s20 = smov [#allocation4]  }
  0x29   :  { %3524 = vmatprep.subr.bf16.mxu1 %v3681_v0  ;;  %v3685_v3 = vld [vmem:[%s4503_s1] sm:$0xff]   ;;  %v3684_v4 = vld [vmem:[%s4502_s0 + $0x18] sm:$0xff]   ;;  %v3686_v6 = vld [vmem:[%s4503_s1 + $0x8] sm:$0xff]   ;;  %s3828_s0 = scalar_lea.hbm %s4514_s12, 8192 }
  0x2a   :  { %3525 = vmatpush3.bf16.msra.mxu1 %v3681_v0  ;;  %3532 = vmatprep.mubr.msk.bf16.mxu1 %vm288_vm0, %v3685_v3  ;;  %v3693_v5 = vld [vmem:[%s4508_s6 + $0x40] sm:$0xff]   ;;  %v3687_v7 = vld [vmem:[%s4503_s1 + $0x10] sm:$0xff]   ;;  %v3695_v9 = vld [vmem:[%s4508_s6 + $0x48] sm:$0xff]   ;;  %p3829_p8 = scmp.ne.s32.totalorder %s4514_s12, %s3828_s0  ;;  %p3832_p9 = scmp.lt.u32.totalorder %s3828_s0, %s4514_s12 }
  0x2b   :  { %3526 = vmatprep.subr.bf16.mxu1 %v3682_v1  ;;  %v3694_v8 = vld [vmem:[%s4508_s6] sm:$0xff]   ;;  %v3696_v10 = vld [vmem:[%s4508_s6 + $0x8] sm:$0xff]   ;;  %v3688_v11 = vld [vmem:[%s4503_s1 + $0x18] sm:$0xff]  }
  0x2c   :  { %v3697_v12 = vld [vmem:[%s4508_s6 + $0x50] sm:$0xff]   ;;  %v3689_v13 = vld [vmem:[%s4503_s1 + $0x20] sm:$0xff]   ;;  %v3699_v16 = vld [vmem:[%s4508_s6 + $0x58] sm:$0xff]   ;;  %p3834_p10 = pnand %p3832_p9, %p3829_p8 }
  0x2d   :  { %v3698_v14 = vld [vmem:[%s4508_s6 + $0x10] sm:$0xff]   ;;  %v3702_v15 = vld [vmem:[%s4508_s6 + $0xc0] sm:$0xff]   ;;  %v3700_v17 = vld [vmem:[%s4508_s6 + $0x18] sm:$0xff]  }
  0x2e   :  { %3527 = vmatpush3.bf16.msra.mxu1 %v3682_v1  ;;  %3309 = vmatprep.subr.bf16.mxu0 %v3702_v15  ;;  %v3701_v18 = vld [vmem:[%s4508_s6 + $0x60] sm:$0xff]   ;;  %v3690_v19 = vld [vmem:[%s4503_s1 + $0x28] sm:$0xff]   ;;  %v3691_v20 = vld [vmem:[%s4503_s1 + $0x30] sm:$0xff]  }
  0x2f   :  { %3528 = vmatprep.subr.bf16.mxu1 %v3683_v2  ;;  %v3692_v21 = vld [vmem:[%s4503_s1 + $0x38] sm:$0xff]   ;;  %v3703_v22 = vld [vmem:[%s4508_s6 + $0x20] sm:$0xff]   ;;  %v3705_v24 = vld [vmem:[%s4508_s6 + $0x68] sm:$0xff]  }
  0x30   :  { %v3704_v23 = vld [vmem:[%s4508_s6 + $0x80] sm:$0xff]   ;;  %v3706_v25 = vld [vmem:[%s4508_s6 + $0xc8] sm:$0xff]   ;;  %v3709_v28 = vld [vmem:[%s4508_s6 + $0x70] sm:$0xff]  }
  0x31   :  { %3310 = vmatpush3.bf16.msra.mxu0 %v3704_v23  ;;  %v3707_v26 = vld [vmem:[%s4508_s6 + $0x28] sm:$0xff]   ;;  %v3710_v29 = vld [vmem:[%s4508_s6 + $0xd0] sm:$0xff]   ;;  %v3713_v32 = vld [vmem:[%s4508_s6 + $0x78] sm:$0xff]  }
  0x32   :  { %3529 = vmatpush3.bf16.msra.mxu1 %v3683_v2  ;;  %v3708_v27 = vld [vmem:[%s4508_s6 + $0x88] sm:$0xff]   ;;  %3311 = vmatprep.subr.bf16.mxu0 %v3706_v25  ;;  %v3711_v30 = vld [vmem:[%s4508_s6 + $0x30] sm:$0xff]   ;;  %v3714_v33 = vld [vmem:[%s4508_s6 + $0xd8] sm:$0xff]  }
  0x33   :  { %3530 = vmatprep.subr.bf16.mxu1 %v3684_v4  ;;  %v3712_v31 = vld [vmem:[%s4508_s6 + $0x90] sm:$0xff]   ;;  %v3715_v34 = vld [vmem:[%s4508_s6 + $0x38] sm:$0xff]   ;;  %v3717_v36 = vld [vmem:[%s4508_s6 + $0xe0] sm:$0xff]  }
  0x34   :  { %v3716_v35 = vld [vmem:[%s4508_s6 + $0x98] sm:$0xff]   ;;  %v3718_v37 = vld [vmem:[%s4508_s6 + $0xa0] sm:$0xff]   ;;  %v3719_v38 = vld [vmem:[%s4508_s6 + $0xe8] sm:$0xff]  }
  0x35   :  { %3312 = vmatpush3.bf16.msra.mxu0 %v3708_v27  ;;  %v3720_v39 = vld [vmem:[%s4508_s6 + $0xa8] sm:$0xff]   ;;  %v3721_v40 = vld [vmem:[%s4508_s6 + $0xf0] sm:$0xff]   ;;  %v3723_v42 = vld [vmem:[%s4508_s6 + $0xf8] sm:$0xff]  }
  0x36   :  { %3531 = vmatpush3.bf16.msra.mxu1 %v3684_v4  ;;  %3313 = vmatprep.subr.bf16.mxu0 %v3710_v29  ;;  %v3722_v41 = vld [vmem:[%s4508_s6 + $0xb0] sm:$0xff]   ;;  %v3724_v43 = vld [vmem:[%s4508_s6 + $0xb8] sm:$0xff]   ;;  %v3725_v4 = vld [vmem:[%s4504_s2] sm:$0xff]  }
  0x37   :  { %3281 = vmatprep.subr.bf16.mxu1 %v3693_v5 }
  0x39   :  { %3533 = vmatmul.mubr.msk.bf16.vlgmr.msra.gmra.mrb[0].mxu1 %vm288_vm0, %v3686_v6  ;;  %3314 = vmatpush3.bf16.msra.mxu0 %v3712_v31 }
  0x3a   :  { %3536 = vmatprep.mubr.msk.bf16.mxu1 %vm288_vm0, %v3687_v7  ;;  %3282 = vmatpush3.bf16.msra.mxu1 %v3694_v8 }
  0x3b   :  { %3283 = vmatprep.subr.bf16.mxu1 %v3695_v9  ;;  %3315 = vmatprep.subr.bf16.mxu0 %v3714_v33 }
  0x3d   :  { %3316 = vmatpush3.bf16.msra.mxu0 %v3716_v35 }
  0x3e   :  { %3284 = vmatpush3.bf16.msra.mxu1 %v3696_v10  ;;  %3317 = vmatprep.subr.bf16.mxu0 %v3717_v36 }
  0x3f   :  { %3285 = vmatprep.subr.bf16.mxu1 %v3697_v12 }
  0x41   :  { %3537 = vmatmul.mubr.msk.bf16.gmra.mrb[4].mxu1 %vm288_vm0, %v3688_v11  ;;  %3318 = vmatpush3.bf16.msra.mxu0 %v3718_v37 }
  0x42   :  { %3540 = vmatprep.mubr.msk.bf16.mxu1 %vm288_vm0, %v3689_v13  ;;  %3286 = vmatpush3.bf16.msra.mxu1 %v3698_v14 }
  0x43   :  { %3287 = vmatprep.subr.bf16.mxu1 %v3699_v16  ;;  %3319 = vmatprep.subr.bf16.mxu0 %v3719_v38 }
  0x45   :  { %3320 = vmatpush3.bf16.msra.mxu0 %v3720_v39 }
  0x46   :  { %3288 = vmatpush3.bf16.msra.mxu1 %v3700_v17  ;;  %3321 = vmatprep.subr.bf16.mxu0 %v3721_v40 }
  0x47   :  { %3289 = vmatprep.subr.bf16.mxu1 %v3701_v18 }
  0x49   :  { %3541 = vmatmul.mubr.msk.bf16.gmra.mrb[8].mxu1 %vm288_vm0, %v3690_v19  ;;  %3322 = vmatpush3.bf16.msra.mxu0 %v3722_v41 }
  0x4a   :  { %3544 = vmatprep.mubr.msk.bf16.mxu1 %vm288_vm0, %v3691_v20  ;;  %3290 = vmatpush3.bf16.msra.mxu1 %v3703_v22 }
  0x4b   :  { %3291 = vmatprep.subr.bf16.mxu1 %v3705_v24  ;;  %3323 = vmatprep.subr.bf16.mxu0 %v3723_v42 }
  0x4d   :  { %3324 = vmatpush3.bf16.msra.mxu0 %v3724_v43 }
  0x4e   :  { %3292 = vmatpush3.bf16.msra.mxu1 %v3707_v26 }
  0x4f   :  { %3293 = vmatprep.subr.bf16.mxu1 %v3709_v28 }
  0x51   :  { %3545 = vmatmul.mubr.msk.bf16.gmra.mrb[12].mxu1 %vm288_vm0, %v3692_v21 }
  0x52   :  { %3294 = vmatpush3.bf16.msra.mxu1 %v3711_v30 }
  0x53   :  { %3295 = vmatprep.subr.bf16.mxu1 %v3713_v32 }
  0x56   :  { %3296 = vmatpush3.bf16.msra.mxu1 %v3715_v34 }
 0x10c   :  { %v3534_v44 = vpop.f32.mrb[0].mxu1 }
 0x10d   :  { %v347_v45 = vpop.f32.mrb[1].mxu1 }
 0x10e   :  { %v3535_v46 = vpop.f32.mrb[2].mxu1 }
 0x10f   :  { %v414_v47 = vpack.c.bf16 %v3535_v46, %v3534_v44  ;;  %v350_v48 = vpop.f32.mrb[3].mxu1 }
 0x110   :  { %v410_v49 = vpack.c.bf16 %v350_v48, %v347_v45 }
 0x114   :  { %v3538_v50 = vpop.f32.mrb[4].mxu1 }
 0x115   :  { %v363_v51 = vpop.f32.mrb[5].mxu1 }
 0x116   :  { %v3539_v52 = vpop.f32.mrb[6].mxu1 }
 0x117   :  { %v415_v53 = vpack.c.bf16 %v3539_v52, %v3538_v50  ;;  %v366_v54 = vpop.f32.mrb[7].mxu1 }
 0x118   :  { %v411_v55 = vpack.c.bf16 %v366_v54, %v363_v51 }
 0x11a   :  { %642 = vmatprep.mubr.bf16.mxu1 %v411_v55 }
 0x11b   :  { %643 = vmatmul.mubr.bf16.vlgmr.msra.gmra.mrb[16].mxu1 %v410_v49 }
 0x11c   :  { %v3542_v56 = vpop.f32.mrb[8].mxu1  ;;  %650 = vmatprep.mubr.bf16.mxu1 %v415_v53 }
 0x11d   :  { %v379_v57 = vpop.f32.mrb[9].mxu1 }
 0x11e   :  { %v3543_v58 = vpop.f32.mrb[10].mxu1 }
 0x11f   :  { %v416_v59 = vpack.c.bf16 %v3543_v58, %v3542_v56  ;;  %v382_v60 = vpop.f32.mrb[11].mxu1 }
 0x120   :  { %v412_v61 = vpack.c.bf16 %v382_v60, %v379_v57 }
 0x123   :  { %651 = vmatmul.mubr.bf16.gmra.mrb[20].mxu1 %v414_v47 }
 0x124   :  { %v3546_v62 = vpop.f32.mrb[12].mxu1  ;;  %3552 = vmatprep.mubr.msk.bf16.mxu1 %vm842_vm1, %v3725_v4 }
 0x125   :  { %v395_v63 = vpop.f32.mrb[13].mxu1 }
 0x126   :  { %v3547_v0 = vpop.f32.mrb[14].mxu1 }
 0x127   :  { %v417_v1 = vpack.c.bf16 %v3547_v0, %v3546_v62  ;;  %v398_v2 = vpop.f32.mrb[15].mxu1  ;;  %v708_v62 = vld [vmem:[%s4510_s8] ss:$0 sm:$0xff] }
 0x128   :  { %v413_v3 = vpack.c.bf16 %v398_v2, %v395_v63 }
 0x12a   :  { %691 = vmatprep.mubr.bf16.mxu0 %v413_v3 }
 0x12b   :  { %692 = vmatmul.mubr.bf16.vlgmr.msra.gmra.mrb[0].mxu0 %v412_v61 }
 0x12c   :  { %699 = vmatprep.mubr.bf16.mxu0 %v417_v1  ;;  %v709_v1 = vld [vmem:[%s4510_s8 + $0x1] ss:$0 sm:$0xff] }
 0x133   :  { %700 = vmatmul.mubr.bf16.gmra.mrb[4].mxu0 %v416_v59 }
 0x1ee   :  { %v3297_v5 = vpop.f32.mrb[16].mxu1 }
 0x1ef   :  { %v3298_v6 = vpop.f32.mrb[17].mxu1 }
 0x1f0   :  { %v3299_v7 = vadd.f32 %v3298_v6, %v3297_v5  ;;  %v3300_v8 = vpop.f32.mrb[18].mxu1 }
 0x1f1   :  { %v3301_v9 = vpop.f32.mrb[19].mxu1 }
 0x1f2   :  { %v3302_v10 = vadd.f32 %v3301_v9, %v3300_v8 }
 0x1f6   :  { %v3303_v11 = vpop.f32.mrb[20].mxu1 }
 0x1f7   :  { %v3304_v12 = vpop.f32.mrb[21].mxu1 }
 0x1f8   :  { %v3305_v13 = vadd.f32 %v3304_v12, %v3303_v11  ;;  %v3306_v14 = vpop.f32.mrb[22].mxu1 }
 0x1f9   :  { %v3307_v15 = vpop.f32.mrb[23].mxu1 }
 0x1fa   :  { %v3308_v16 = vadd.f32 %v3307_v15, %v3306_v14 }
 0x1fe   :  { %v3325_v17 = vpop.f32.mrb[0].mxu0 }
 0x1ff   :  { %v3326_v18 = vpop.f32.mrb[1].mxu0 }
 0x200   :  { %v3327_v19 = vadd.f32 %v3326_v18, %v3325_v17  ;;  %v3328_v20 = vpop.f32.mrb[2].mxu0 }
 0x201   :  { %v3329_v21 = vpop.f32.mrb[3].mxu0 }
 0x202   :  { %v694_v22 = vadd.f32 %v3327_v19, %v3299_v7  ;;  %v3330_v23 = vadd.f32 %v3329_v21, %v3328_v20  ;;  %v3726_v19 = vld [vmem:[%s4504_s2 + $0x8] sm:$0xff]   ;;  %v3727_v20 = vld [vmem:[%s4504_s2 + $0x10] sm:$0xff]   ;;  %v3728_v21 = vld [vmem:[%s4504_s2 + $0x18] sm:$0xff]  }
 0x204   :  { %v697_v24 = vadd.f32 %v3330_v23, %v3302_v10  ;;  %v722_v25 = vmul.f32 %v694_v22, %v694_v22  ;;  %v3730_v23 = vld [vmem:[%s4504_s2 + $0x28] sm:$0xff]  }
 0x206   :  { %v710_v26 = vadd.f32 %v697_v24, %v694_v22  ;;  %v723_v27 = vmul.f32 %v697_v24, %v697_v24  ;;  %v3331_v28 = vpop.f32.mrb[4].mxu0 }
 0x207   :  { %v3332_v29 = vpop.f32.mrb[5].mxu0 }
 0x208   :  { %v726_v30 = vadd.f32 %v723_v27, %v722_v25  ;;  %v3333_v31 = vadd.f32 %v3332_v29, %v3331_v28  ;;  %v3334_v32 = vpop.f32.mrb[6].mxu0  ;;  %v3732_v25 = vld [vmem:[%s4504_s2 + $0x38] sm:$0xff]   ;;  %v3734_v27 = vld [vmem:[%s4504_s2 + $0x48] sm:$0xff]   ;;  %v3735_v28 = vld [vmem:[%s4504_s2 + $0x50] sm:$0xff]  }
 0x209   :  { %v3335_v33 = vpop.f32.mrb[7].mxu0  ;;  %v3736_v29 = vld [vmem:[%s4504_s2 + $0x58] sm:$0xff]  }
 0x20a   :  { %v702_v34 = vadd.f32 %v3333_v31, %v3305_v13  ;;  %v3336_v35 = vadd.f32 %v3335_v33, %v3334_v32  ;;  %v3745_v31 = vld [vmem:[#allocation6 + $0xc0] sm:$0xff]   ;;  %v3750_v33 = vld [vmem:[#allocation6 + $0xc8] sm:$0xff]  }
 0x20b   :  { %v3746_v32 = vld [vmem:[#allocation6 + $0x80] sm:$0xff]  }
 0x20c   :  { %v711_v36 = vadd.f32 %v710_v26, %v702_v34  ;;  %v724_v37 = vmul.f32 %v702_v34, %v702_v34  ;;  %v705_v38 = vadd.f32 %v3336_v35, %v3308_v16  ;;  %v3733_v26 = vld [vmem:[%s4504_s2 + $0x40] sm:$0xff]   ;;  %v3755_v35 = vld [vmem:[#allocation6 + $0xd0] sm:$0xff]  }
 0x20e   :  { %v727_v39 = vadd.f32 %v726_v30, %v724_v37  ;;  %v713_v40 = vsel %vm712_vm2, %v705_v38, 0.0  ;;  %v725_v41 = vmul.f32 %v705_v38, %v705_v38  ;;  %v3737_v30 = vld [vmem:[%s4505_s3] sm:$0xff]  }
 0x20f   :  { %v714_v42 = vadd.f32 %v713_v40, %v711_v36  ;;  %3582 = vmatprep.mubr.msk.bf16.mxu0 %vm1139_vm4, %v3737_v30  ;;  %v3756_v36 = vld [vmem:[#allocation6 + $0x90] sm:$0xff]   ;;  %v3757_v30 = vld [vmem:[#allocation6 + $0x60] sm:$0xff]  }
 0x210   :  { %v728_v43 = vsel %vm712_vm2, %v725_v41, 0.0 }
 0x211   :  { %v715_v44 = vrot.slane %v714_v42, 4  ;;  %v729_v45 = vadd.f32 %v728_v43, %v727_v39 }
 0x213   :  { %v716_v46 = vadd.f32 %v715_v44, %v714_v42  ;;  %v730_v47 = vrot.slane %v729_v45, 4 }
 0x215   :  { %v717_v48 = vrot.slane %v716_v46, 2  ;;  %v731_v49 = vadd.f32 %v730_v47, %v729_v45 }
 0x217   :  { %v718_v50 = vadd.f32 %v717_v48, %v716_v46  ;;  %v732_v51 = vrot.slane %v731_v49, 2 }
 0x219   :  { %v719_v52 = vrot.slane %v718_v50, 1  ;;  %v733_v53 = vadd.f32 %v732_v51, %v731_v49 }
 0x21b   :  { %v720_v54 = vadd.f32 %v719_v52, %v718_v50  ;;  %v734_v55 = vrot.slane %v733_v53, 1 }
 0x21d   :  { %v721_v56 = vmul.f32 0.033333335, %v720_v54  ;;  %v735_v57 = vadd.f32 %v734_v55, %v733_v53 }
 0x21f   :  { %v736_v58 = vmul.f32 0.033333335, %v735_v57  ;;  %v737_v59 = vmul.f32 %v721_v56, %v721_v56 }
 0x221   :  { %v738_v60 = vsub.f32 %v736_v58, %v737_v59 }
 0x223   :  { %v739_v61 = vadd.f32 1e-05, %v738_v60 }
 0x225   :  { %3785 = vrsqrt.f32 %v739_v61 }
 0x22f   :  { %v3786_v63 = vpop.eup %3785 }
 0x230   :  { %v741_v0 = vmul.f32 %v3786_v63, %v708_v62 }
 0x232   :  { %v742_v2 = vmul.f32 %v741_v0, %v721_v56  ;;  %v747_v3 = vmul.f32 %v741_v0, %v705_v38  ;;  %v744_v4 = vmul.f32 %v741_v0, %v694_v22  ;;  %v745_v5 = vmul.f32 %v741_v0, %v697_v24  ;;  %v3729_v22 = vld [vmem:[%s4504_s2 + $0x20] sm:$0xff]   ;;  %v3731_v24 = vld [vmem:[%s4504_s2 + $0x30] sm:$0xff]  }
 0x233   :  { %v746_v6 = vmul.f32 %v741_v0, %v702_v34  ;;  %v3752_v34 = vld [vmem:[#allocation6 + $0x88] sm:$0xff]  }
 0x234   :  { %v743_v7 = vsub.f32 %v709_v1, %v742_v2 }
 0x236   :  { %v751_v8 = vadd.f32 %v747_v3, %v743_v7  ;;  %v748_v9 = vadd.f32 %v744_v4, %v743_v7  ;;  %v749_v10 = vadd.f32 %v745_v5, %v743_v7  ;;  %v750_v11 = vadd.f32 %v746_v6, %v743_v7 }
 0x238   :  { %v752_v12 = vmax.f32 %v748_v9, 0.0  ;;  %v753_v13 = vmax.f32 %v749_v10, 0.0  ;;  %v754_v14 = vmax.f32 %v750_v11, 0.0  ;;  %v755_v15 = vmax.f32 %v751_v8, 0.0 }
 0x23a   :  { %v756_v16 = vpack.c.bf16 %v753_v13, %v752_v12  ;;  %v757_v17 = vpack.c.bf16 %v755_v15, %v754_v14 }
 0x23c   :  { %3548 = vmatprep.subr.bf16.mxu1 %v756_v16  ;;  %v881_v18 = vsel %vm879_vm3, %v757_v17, 0 }
 0x23d   :  { %3549 = vmatpush3.bf16.msra.mxu1 %v756_v16 }
 0x23e   :  { %3660 = vmatprep.subr.msk.bf16.mxu1 %vm879_vm3, %v757_v17 }
 0x241   :  { %3551 = vmatpush3.bf16.msra.mxu1 %v881_v18  ;;  %v3743_v18 = vld [vmem:[#allocation6 + $0x40] sm:$0xff]  }
 0x242   :  { %3388 = vmatprep.subr.bf16.mxu1 %v3745_v31  ;;  %v3742_v31 = vld [vmem:[%s4505_s3 + $0x28] sm:$0xff]  }
 0x244   :  { %3553 = vmatmul.mubr.msk.bf16.vlgmr.msra.gmra.mrb[24].mxu1 %vm842_vm1, %v3726_v19  ;;  %v3738_v19 = vld [vmem:[%s4505_s3 + $0x8] sm:$0xff]  }
 0x245   :  { %3556 = vmatprep.mubr.msk.bf16.mxu1 %vm842_vm1, %v3727_v20  ;;  %3389 = vmatpush3.bf16.msra.mxu1 %v3746_v32  ;;  %v3739_v20 = vld [vmem:[%s4505_s3 + $0x10] sm:$0xff]   ;;  %v3758_v32 = vld [vmem:[#allocation6 + $0x20] sm:$0xff]  }
 0x246   :  { %3390 = vmatprep.subr.bf16.mxu1 %v3750_v33  ;;  %v3759_v33 = vld [vmem:[#allocation6 + $0x68] sm:$0xff]  }
 0x249   :  { %3391 = vmatpush3.bf16.msra.mxu1 %v3752_v34  ;;  %v3760_v34 = vld [vmem:[#allocation6 + $0xd8] sm:$0xff]  }
 0x24a   :  { %3392 = vmatprep.subr.bf16.mxu1 %v3755_v35  ;;  %v3761_v35 = vld [vmem:[#allocation6 + $0x28] sm:$0xff]  }
 0x24c   :  { %3557 = vmatmul.mubr.msk.bf16.gmra.mrb[28].mxu1 %vm842_vm1, %v3728_v21  ;;  %v3744_v21 = vld [vmem:[#allocation6] sm:$0xff]  }
 0x24d   :  { %3560 = vmatprep.mubr.msk.bf16.mxu1 %vm842_vm1, %v3729_v22  ;;  %3393 = vmatpush3.bf16.msra.mxu1 %v3756_v36  ;;  %v3747_v22 = vld [vmem:[#allocation6 + $0x48] sm:$0xff]   ;;  %v3762_v36 = vld [vmem:[#allocation6 + $0x98] sm:$0xff]  }
 0x24e   :  { %3394 = vmatprep.subr.bf16.mxu1 %v3760_v34 }
 0x251   :  { %3395 = vmatpush3.bf16.msra.mxu1 %v3762_v36 }
 0x254   :  { %3561 = vmatmul.mubr.msk.bf16.gmra.mrb[32].mxu1 %vm842_vm1, %v3730_v23  ;;  %v3748_v23 = vld [vmem:[#allocation6 + $0x8] sm:$0xff]  }
 0x255   :  { %3564 = vmatprep.mubr.msk.bf16.mxu1 %vm842_vm1, %v3731_v24  ;;  %v3749_v24 = vld [vmem:[#allocation6 + $0x50] sm:$0xff]  }
 0x25c   :  { %3565 = vmatmul.mubr.msk.bf16.gmra.mrb[36].mxu1 %vm842_vm1, %v3732_v25  ;;  %v3740_v25 = vld [vmem:[%s4505_s3 + $0x18] sm:$0xff]  }
 0x25d   :  { %3568 = vmatprep.mubr.msk.bf16.mxu1 %vm842_vm1, %v3733_v26  ;;  %v3741_v26 = vld [vmem:[%s4505_s3 + $0x20] sm:$0xff]   ;;  %s132_s3 = sshll.u32 %s3895_s20, 4  ;;  %s133_s3 = int_to_ptr.vmem [resolvable:$true] %s132_s3 }
 0x264   :  { %3569 = vmatmul.mubr.msk.bf16.gmra.mrb[40].mxu1 %vm842_vm1, %v3734_v27  ;;  %v3751_v27 = vld [vmem:[#allocation6 + $0x10] sm:$0xff]  }
 0x265   :  { %3572 = vmatprep.mubr.msk.bf16.mxu1 %vm842_vm1, %v3735_v28  ;;  %v3753_v28 = vld [vmem:[#allocation6 + $0x58] sm:$0xff]  }
 0x26c   :  { %3573 = vmatmul.mubr.msk.bf16.gmra.mrb[44].mxu1 %vm842_vm1, %v3736_v29  ;;  %v3754_v29 = vld [vmem:[#allocation6 + $0x18] sm:$0xff]  }
 0x317   :  { %v3554_v37 = vpop.f32.mrb[24].mxu1 }
 0x318   :  { %v917_v38 = vpop.f32.mrb[25].mxu1 }
 0x319   :  { %v3555_v39 = vpop.f32.mrb[26].mxu1 }
 0x31a   :  { %v920_v40 = vpop.f32.mrb[27].mxu1 }
 0x31f   :  { %v3558_v41 = vpop.f32.mrb[28].mxu1 }
 0x320   :  { %v1012_v42 = vmax.f32 %v917_v38, %v3558_v41  ;;  %v933_v43 = vpop.f32.mrb[29].mxu1  ;;  %v3764_v38 = vld [vmem:[#allocation6 + $0x30] sm:$0xff]   ;;  %v3767_v41 = vld [vmem:[#allocation6 + $0x78] sm:$0xff]  }
 0x321   :  { %v3559_v44 = vpop.f32.mrb[30].mxu1 }
 0x322   :  { %v1013_v45 = vmax.f32 %v920_v40, %v3559_v44  ;;  %v936_v46 = vpop.f32.mrb[31].mxu1  ;;  %v3766_v40 = vld [vmem:[#allocation6 + $0xa0] sm:$0xff]   ;;  %v3770_v44 = vld [vmem:[#allocation6 + $0xa8] sm:$0xff]  }
 0x327   :  { %v3562_v47 = vpop.f32.mrb[32].mxu1 }
 0x328   :  { %v1016_v48 = vmax.f32 %v933_v43, %v3562_v47  ;;  %v949_v49 = vpop.f32.mrb[33].mxu1  ;;  %v3769_v43 = vld [vmem:[#allocation6 + $0xe8] sm:$0xff]   ;;  %v3773_v47 = vld [vmem:[#allocation6 + $0xf8] sm:$0xff]  }
 0x329   :  { %v1014_v50 = vmax.f32 %v3554_v37, %v949_v49  ;;  %v3563_v51 = vpop.f32.mrb[34].mxu1  ;;  %v3763_v37 = vld [vmem:[#allocation6 + $0x70] sm:$0xff]  }
 0x32a   :  { %v1017_v52 = vmax.f32 %v936_v46, %v3563_v51  ;;  %v952_v53 = vpop.f32.mrb[35].mxu1  ;;  %v3772_v46 = vld [vmem:[#allocation6 + $0xb0] sm:$0xff]  }
 0x32b   :  { %v1015_v54 = vmax.f32 %v3555_v39, %v952_v53  ;;  %v3765_v39 = vld [vmem:[#allocation6 + $0xe0] sm:$0xff]  }
 0x32c   :  { %3396 = vmatprep.subr.bf16.mxu1 %v3765_v39 }
 0x32d   :  { %3397 = vmatpush3.bf16.msra.mxu1 %v3766_v40 }
 0x32e   :  { %3398 = vmatprep.subr.bf16.mxu1 %v3769_v43 }
 0x32f   :  { %v3566_v55 = vpop.f32.mrb[36].mxu1 }
 0x330   :  { %v1020_v56 = vmax.f32 %v1014_v50, %v3566_v55  ;;  %v965_v57 = vpop.f32.mrb[37].mxu1 }
 0x331   :  { %v1018_v58 = vmax.f32 %v1012_v42, %v965_v57  ;;  %v3567_v59 = vpop.f32.mrb[38].mxu1  ;;  %v3768_v42 = vld [vmem:[#allocation6 + $0x38] sm:$0xff]   ;;  %3399 = vmatpush3.bf16.msra.mxu1 %v3770_v44 }
 0x332   :  { %v1021_v60 = vmax.f32 %v1015_v54, %v3567_v59  ;;  %v968_v61 = vpop.f32.mrb[39].mxu1 }
 0x333   :  { %v1019_v62 = vmax.f32 %v1013_v45, %v968_v61  ;;  %v3771_v45 = vld [vmem:[#allocation6 + $0xf0] sm:$0xff]  }
 0x334   :  { %3400 = vmatprep.subr.bf16.mxu1 %v3771_v45 }
 0x335   :  { %3401 = vmatpush3.bf16.msra.mxu1 %v3772_v46 }
 0x336   :  { %3402 = vmatprep.subr.bf16.mxu1 %v3773_v47 }
 0x337   :  { %v3570_v63 = vpop.f32.mrb[40].mxu1 }
 0x338   :  { %v1024_v0 = vmax.f32 %v1018_v58, %v3570_v63  ;;  %v981_v1 = vpop.f32.mrb[41].mxu1 }
 0x339   :  { %v1022_v2 = vmax.f32 %v1016_v48, %v981_v1  ;;  %v3571_v3 = vpop.f32.mrb[42].mxu1  ;;  %v3774_v48 = vld [vmem:[#allocation6 + $0xb8] sm:$0xff]  }
 0x33a   :  { %v1025_v4 = vmax.f32 %v1019_v62, %v3571_v3  ;;  %v984_v5 = vpop.f32.mrb[43].mxu1  ;;  %3403 = vmatpush3.bf16.msra.mxu1 %v3774_v48 }
 0x33b   :  { %v1023_v6 = vmax.f32 %v1017_v52, %v984_v5  ;;  %v3775_v5 = vld [vmem:[%s4506_s4] sm:$0xff]  }
 0x33c   :  { %v1030_v7 = vpack.c.bf16 %v1025_v4, %v1024_v0 }
 0x33e   :  { %3576 = vmatprep.subr.bf16.mxu0 %v1030_v7 }
 0x33f   :  { %v3574_v8 = vpop.f32.mrb[44].mxu1  ;;  %3577 = vmatpush3.bf16.msra.mxu0 %v1030_v7 }
 0x340   :  { %v1028_v9 = vmax.f32 %v1022_v2, %v3574_v8  ;;  %v997_v10 = vpop.f32.mrb[45].mxu1 }
 0x341   :  { %v1026_v11 = vmax.f32 %v1020_v56, %v997_v10  ;;  %v3575_v12 = vpop.f32.mrb[46].mxu1 }
 0x342   :  { %v1029_v13 = vmax.f32 %v1023_v6, %v3575_v12  ;;  %v1000_v14 = vpop.f32.mrb[47].mxu1 }
 0x343   :  { %v1027_v15 = vmax.f32 %v1021_v60, %v1000_v14 }
 0x344   :  { %v1032_v16 = vpack.c.bf16 %v1029_v13, %v1028_v9 }
 0x345   :  { %v1031_v17 = vpack.c.bf16 %v1027_v15, %v1026_v11 }
 0x347   :  { %3578 = vmatprep.subr.bf16.mxu0 %v1031_v17 }
 0x348   :  { %3579 = vmatpush3.bf16.msra.mxu0 %v1031_v17 }
 0x349   :  { %3580 = vmatprep.subr.bf16.mxu0 %v1032_v16 }
 0x34c   :  { %3581 = vmatpush3.bf16.msra.mxu0 %v1032_v16 }
 0x34d   :  { %3360 = vmatprep.subr.bf16.mxu0 %v3743_v18 }
 0x34f   :  { %3583 = vmatmul.mubr.msk.bf16.vlgmr.msra.gmra.mrb[8].mxu0 %vm1139_vm4, %v3738_v19 }
 0x350   :  { %3586 = vmatprep.mubr.msk.bf16.mxu0 %vm1139_vm4, %v3739_v20  ;;  %3361 = vmatpush3.bf16.msra.mxu0 %v3744_v21 }
 0x351   :  { %3362 = vmatprep.subr.bf16.mxu0 %v3747_v22 }
 0x354   :  { %3363 = vmatpush3.bf16.msra.mxu0 %v3748_v23 }
 0x355   :  { %3364 = vmatprep.subr.bf16.mxu0 %v3749_v24 }
 0x357   :  { %3587 = vmatmul.mubr.msk.bf16.gmra.mrb[12].mxu0 %vm1139_vm4, %v3740_v25 }
 0x358   :  { %3590 = vmatprep.mubr.msk.bf16.mxu0 %vm1139_vm4, %v3741_v26  ;;  %3365 = vmatpush3.bf16.msra.mxu0 %v3751_v27 }
 0x359   :  { %3366 = vmatprep.subr.bf16.mxu0 %v3753_v28 }
 0x35c   :  { %3367 = vmatpush3.bf16.msra.mxu0 %v3754_v29 }
 0x35d   :  { %3368 = vmatprep.subr.bf16.mxu0 %v3757_v30 }
 0x35f   :  { %3591 = vmatmul.mubr.msk.bf16.gmra.mrb[16].mxu0 %vm1139_vm4, %v3742_v31 }
 0x360   :  { %3369 = vmatpush3.bf16.msra.mxu0 %v3758_v32 }
 0x361   :  { %3370 = vmatprep.subr.bf16.mxu0 %v3759_v33 }
 0x364   :  { %3371 = vmatpush3.bf16.msra.mxu0 %v3761_v35 }
 0x365   :  { %3372 = vmatprep.subr.bf16.mxu0 %v3763_v37 }
 0x368   :  { %3373 = vmatpush3.bf16.msra.mxu0 %v3764_v38 }
 0x369   :  { %3374 = vmatprep.subr.bf16.mxu0 %v3767_v41 }
 0x36c   :  { %3375 = vmatpush3.bf16.msra.mxu0 %v3768_v42 }
 0x422   :  { %v3584_v49 = vpop.f32.mrb[8].mxu0 }
 0x423   :  { %v1192_v50 = vpop.f32.mrb[9].mxu0  ;;  %v1243_v0 = vpack.c.bf16 %v3584_v49, %v3584_v49 }
 0x424   :  { %v3585_v51 = vpop.f32.mrb[10].mxu0 }
 0x425   :  { %v1195_v52 = vpop.f32.mrb[11].mxu0 }
 0x426   :  { %v1239_v53 = vpack.c.bf16 %v1195_v52, %v1192_v50 }
 0x42a   :  { %v3588_v54 = vpop.f32.mrb[12].mxu0 }
 0x42b   :  { %v1208_v55 = vpop.f32.mrb[13].mxu0 }
 0x42c   :  { %v1240_v56 = vpack.c.bf16 %v1208_v55, %v3585_v51  ;;  %v3589_v57 = vpop.f32.mrb[14].mxu0  ;;  %v1535_v55 = vld [vmem:[%s4510_s8 + $0x2] ss:$0 sm:$0xff] }
 0x42d   :  { %v1241_v58 = vpack.c.bf16 %v3589_v57, %v3588_v54  ;;  %v1211_v59 = vpop.f32.mrb[15].mxu0 }
 0x42e   :  { %v1244_v60 = vpack.c.bf16 %v1211_v59, %v1211_v59  ;;  %1471 = vmatprep.mubr.bf16.mxu0 %v1240_v56 }
 0x42f   :  { %1472 = vmatmul.mubr.bf16.vlgmr.msra.gmra.mrb[20].mxu0 %v1239_v53 }
 0x430   :  { %1479 = vmatprep.mubr.bf16.mxu0 %v1244_v60 }
 0x432   :  { %v3592_v61 = vpop.f32.mrb[16].mxu0 }
 0x433   :  { %v1224_v62 = vpop.f32.mrb[17].mxu0 }
 0x434   :  { %v3593_v63 = vpop.f32.mrb[18].mxu0  ;;  %v1245_v4 = vpack.c.bf16 %v1224_v62, %v1224_v62 }
 0x435   :  { %v1227_v1 = vpop.f32.mrb[19].mxu0  ;;  %v1246_v3 = vpack.c.bf16 %v3593_v63, %v3593_v63 }
 0x436   :  { %v1242_v2 = vpack.c.bf16 %v3592_v61, %v1227_v1 }
 0x437   :  { %1480 = vmatmul.mubr.bf16.gmra.mrb[24].mxu0 %v1243_v0 }
 0x438   :  { %1519 = vmatprep.mubr.bf16.mxu1 %v1242_v2  ;;  %3598 = vmatprep.mubr.msk.bf16.mxu0 %vm1646_vm5, %v3775_v5 }
 0x439   :  { %1520 = vmatmul.mubr.bf16.vlgmr.msra.gmra.mrb[48].mxu1 %v1241_v58  ;;  %v1536_v58 = vld [vmem:[%s4510_s8 + $0x3] ss:$0 sm:$0xff] }
 0x43a   :  { %1527 = vmatprep.mubr.bf16.mxu1 %v1246_v3 }
 0x441   :  { %1528 = vmatmul.mubr.bf16.gmra.mrb[52].mxu1 %v1245_v4 }
 0x502   :  { %v3376_v6 = vpop.f32.mrb[20].mxu0 }
 0x503   :  { %v3377_v7 = vpop.f32.mrb[21].mxu0 }
 0x504   :  { %v3378_v8 = vadd.f32 %v3377_v7, %v3376_v6  ;;  %v3379_v9 = vpop.f32.mrb[22].mxu0 }
 0x505   :  { %v3380_v10 = vpop.f32.mrb[23].mxu0 }
 0x506   :  { %v3381_v11 = vadd.f32 %v3380_v10, %v3379_v9  ;;  %v3776_v9 = vld [vmem:[%s4506_s4 + $0x8] sm:$0xff]   ;;  %v3777_v10 = vld [vmem:[%s4506_s4 + $0x10] sm:$0xff]  }
 0x50a   :  { %v3382_v12 = vpop.f32.mrb[24].mxu0 }
 0x50b   :  { %v3383_v13 = vpop.f32.mrb[25].mxu0 }
 0x50c   :  { %v3384_v14 = vadd.f32 %v3383_v13, %v3382_v12  ;;  %v3385_v15 = vpop.f32.mrb[26].mxu0  ;;  %v3404_v16 = vpop.f32.mrb[48].mxu1  ;;  %v3779_v12 = vld [vmem:[%s4506_s4 + $0x20] sm:$0xff]   ;;  %v3780_v13 = vld [vmem:[%s4506_s4 + $0x28] sm:$0xff]  }
 0x50d   :  { %v3386_v17 = vpop.f32.mrb[27].mxu0  ;;  %v3405_v18 = vpop.f32.mrb[49].mxu1  ;;  %v3782_v15 = vld [vmem:[%s4506_s4 + $0x38] sm:$0xff]  }
 0x50e   :  { %v3406_v19 = vadd.f32 %v3405_v18, %v3404_v16  ;;  %v3407_v20 = vpop.f32.mrb[50].mxu1  ;;  %v3783_v16 = vld [vmem:[%s4506_s4 + $0x40] sm:$0xff]   ;;  %v3784_v17 = vld [vmem:[%s4506_s4 + $0x48] sm:$0xff]  }
 0x50f   :  { %v3408_v21 = vpop.f32.mrb[51].mxu1 }
 0x510   :  { %v1522_v22 = vadd.f32 %v3406_v19, %v3378_v8  ;;  %v3409_v23 = vadd.f32 %v3408_v21, %v3407_v20 }
 0x512   :  { %v1525_v24 = vadd.f32 %v3409_v23, %v3381_v11  ;;  %v1546_v25 = vmul.f32 %v1522_v22, %v1522_v22  ;;  %v3778_v11 = vld [vmem:[%s4506_s4 + $0x18] sm:$0xff]  }
 0x514   :  { %v1537_v26 = vadd.f32 %v1525_v24, %v1522_v22  ;;  %v1547_v27 = vmul.f32 %v1525_v24, %v1525_v24  ;;  %v3410_v28 = vpop.f32.mrb[52].mxu1 }
 0x515   :  { %v3411_v29 = vpop.f32.mrb[53].mxu1 }
 0x516   :  { %v1549_v30 = vadd.f32 %v1547_v27, %v1546_v25  ;;  %v3412_v31 = vadd.f32 %v3411_v29, %v3410_v28  ;;  %v3413_v32 = vpop.f32.mrb[54].mxu1 }
 0x517   :  { %v3414_v33 = vpop.f32.mrb[55].mxu1 }
 0x518   :  { %v1530_v34 = vadd.f32 %v3412_v31, %v3384_v14  ;;  %v3781_v14 = vld [vmem:[%s4506_s4 + $0x30] sm:$0xff]  }
 0x51a   :  { %v1538_v35 = vadd.f32 %v1537_v26, %v1530_v34  ;;  %v1548_v36 = vmul.f32 %v1530_v34, %v1530_v34 }
 0x51c   :  { %v1539_v37 = vrot.slane %v1538_v35, 4  ;;  %v1550_v38 = vadd.f32 %v1549_v30, %v1548_v36 }
 0x51e   :  { %v1540_v39 = vadd.f32 %v1539_v37, %v1538_v35  ;;  %v1551_v40 = vrot.slane %v1550_v38, 4 }
 0x520   :  { %v1541_v41 = vrot.slane %v1540_v39, 2  ;;  %v1552_v42 = vadd.f32 %v1551_v40, %v1550_v38 }
 0x522   :  { %v1542_v43 = vadd.f32 %v1541_v41, %v1540_v39  ;;  %v1553_v44 = vrot.slane %v1552_v42, 2 }
 0x524   :  { %v1543_v45 = vrot.slane %v1542_v43, 1  ;;  %v1554_v46 = vadd.f32 %v1553_v44, %v1552_v42 }
 0x526   :  { %v1544_v47 = vadd.f32 %v1543_v45, %v1542_v43  ;;  %v1555_v48 = vrot.slane %v1554_v46, 1 }
 0x528   :  { %v1545_v49 = vmul.f32 0.041666668, %v1544_v47  ;;  %v1556_v50 = vadd.f32 %v1555_v48, %v1554_v46 }
 0x52a   :  { %v1557_v51 = vmul.f32 0.041666668, %v1556_v50  ;;  %v1558_v52 = vmul.f32 %v1545_v49, %v1545_v49 }
 0x52c   :  { %v1559_v53 = vsub.f32 %v1557_v51, %v1558_v52 }
 0x52e   :  { %v1560_v54 = vadd.f32 1e-05, %v1559_v53 }
 0x530   :  { %3787 = vrsqrt.f32 %v1560_v54 }
 0x53a   :  { %v3788_v56 = vpop.eup %3787 }
 0x53b   :  { %v1562_v57 = vmul.f32 %v3788_v56, %v1535_v55 }
 0x53d   :  { %v1567_v59 = vmul.f32 %v1562_v57, %v1530_v34  ;;  %v1563_v60 = vmul.f32 %v1562_v57, %v1545_v49  ;;  %v1565_v61 = vmul.f32 %v1562_v57, %v1522_v22  ;;  %v1566_v62 = vmul.f32 %v1562_v57, %v1525_v24 }
 0x53f   :  { %v1564_v63 = vsub.f32 %v1536_v58, %v1563_v60 }
 0x541   :  { %v1568_v0 = vadd.f32 %v1565_v61, %v1564_v63  ;;  %v1569_v1 = vadd.f32 %v1566_v62, %v1564_v63  ;;  %v1570_v2 = vadd.f32 %v1567_v59, %v1564_v63 }
 0x543   :  { %v1571_v3 = vmax.f32 %v1568_v0, 0.0  ;;  %v1572_v4 = vmax.f32 %v1569_v1, 0.0  ;;  %v1573_v5 = vmax.f32 %v1570_v2, 0.0 }
 0x545   :  { %v1574_v6 = vpack.c.bf16 %v1572_v4, %v1571_v3  ;;  %v1575_v7 = vpack.c.bf16 %v1573_v5, %v1573_v5 }
 0x547   :  { %3594 = vmatprep.subr.bf16.mxu0 %v1574_v6  ;;  %v1679_v8 = vsel %vm1677_vm6, %v1575_v7, 0 }
 0x548   :  { %3595 = vmatpush3.bf16.msra.mxu0 %v1574_v6 }
 0x549   :  { %3661 = vmatprep.subr.msk.bf16.mxu0 %vm1677_vm6, %v1575_v7 }
 0x54c   :  { %3597 = vmatpush3.bf16.msra.mxu0 %v1679_v8 }
 0x54f   :  { %3599 = vmatmul.mubr.msk.bf16.vlgmr.msra.gmra.mrb[28].mxu0 %vm1646_vm5, %v3776_v9 }
 0x550   :  { %3602 = vmatprep.mubr.msk.bf16.mxu0 %vm1646_vm5, %v3777_v10 }
 0x557   :  { %3603 = vmatmul.mubr.msk.bf16.gmra.mrb[32].mxu0 %vm1646_vm5, %v3778_v11 }
 0x558   :  { %3606 = vmatprep.mubr.msk.bf16.mxu0 %vm1646_vm5, %v3779_v12 }
 0x55f   :  { %3607 = vmatmul.mubr.msk.bf16.gmra.mrb[36].mxu0 %vm1646_vm5, %v3780_v13 }
 0x560   :  { %3610 = vmatprep.mubr.msk.bf16.mxu0 %vm1646_vm5, %v3781_v14 }
 0x567   :  { %3611 = vmatmul.mubr.msk.bf16.gmra.mrb[40].mxu0 %vm1646_vm5, %v3782_v15 }
 0x568   :  { %3614 = vmatprep.mubr.msk.bf16.mxu0 %vm1646_vm5, %v3783_v16 }
 0x56f   :  { %3615 = vmatmul.mubr.msk.bf16.gmra.mrb[44].mxu0 %vm1646_vm5, %v3784_v17 }
 0x570   :  { %3837 = shalt.err (!%p3834_p10)  }
 0x571   :  { %s3838_s4 = scalar_lea.vmem %s133_s3, 8192  ;;  %p3843_p12 = scmp.lt.s32.totalorder %s133_s3, %s133_s3 }
 0x572   :  { %p3839_p11 = scmp.ne.s32.totalorder %s133_s3, %s3838_s4  ;;  %p3844_p13 = scmp.lt.s32.totalorder %s3838_s4, %s3838_s4 }
 0x574   :  { %p3845_p0 = por %p3844_p13, %p3843_p12 }
 0x576   :  { %p3846_p1 = pnand %p3845_p0, %p3839_p11 }
 0x578   :  { %3849 = shalt.err (!%p3846_p1)  }
 0x579   :  { %135 = dma.hbm_to_vmem [thread:$0]  %s4514_s12, 8192, %s133_s3, [#allocation5 + $0x2] }
 0x622   :  { %v3600_v18 = vpop.f32.mrb[28].mxu0 }
 0x623   :  { %v1715_v19 = vpop.f32.mrb[29].mxu0 }
 0x624   :  { %v3601_v20 = vpop.f32.mrb[30].mxu0 }
 0x625   :  { %v1718_v21 = vpop.f32.mrb[31].mxu0 }
 0x62a   :  { %v3604_v22 = vpop.f32.mrb[32].mxu0 }
 0x62b   :  { %v1795_v23 = vmax.f32 %v1718_v21, %v3604_v22  ;;  %v1731_v24 = vpop.f32.mrb[33].mxu0 }
 0x62c   :  { %v3605_v25 = vpop.f32.mrb[34].mxu0 }
 0x62d   :  { %v1796_v26 = vmax.f32 %v3600_v18, %v3605_v25  ;;  %v1734_v27 = vpop.f32.mrb[35].mxu0 }
 0x62e   :  { %v1794_v28 = vmax.f32 %v1715_v19, %v1734_v27 }
 0x632   :  { %v3608_v29 = vpop.f32.mrb[36].mxu0 }
 0x633   :  { %v1799_v30 = vmax.f32 %v1794_v28, %v3608_v29  ;;  %v1747_v31 = vpop.f32.mrb[37].mxu0 }
 0x634   :  { %v1797_v32 = vmax.f32 %v3601_v20, %v1747_v31  ;;  %v3609_v33 = vpop.f32.mrb[38].mxu0 }
 0x635   :  { %v1800_v34 = vmax.f32 %v1795_v23, %v3609_v33  ;;  %v1750_v35 = vpop.f32.mrb[39].mxu0 }
 0x636   :  { %v1798_v36 = vmax.f32 %v1731_v24, %v1750_v35 }
 0x63a   :  { %v3612_v37 = vpop.f32.mrb[40].mxu0 }
 0x63b   :  { %v1803_v38 = vmax.f32 %v1798_v36, %v3612_v37  ;;  %v1763_v39 = vpop.f32.mrb[41].mxu0 }
 0x63c   :  { %v1801_v40 = vmax.f32 %v1796_v26, %v1763_v39  ;;  %v3613_v41 = vpop.f32.mrb[42].mxu0 }
 0x63d   :  { %v1804_v42 = vmax.f32 %v1799_v30, %v3613_v41  ;;  %v1766_v43 = vpop.f32.mrb[43].mxu0 }
 0x63e   :  { %v1802_v44 = vmax.f32 %v1797_v32, %v1766_v43 }
 0x642   :  { %v3616_v45 = vpop.f32.mrb[44].mxu0 }
 0x643   :  { %v1807_v46 = vmax.f32 %v1802_v44, %v3616_v45  ;;  %v1779_v47 = vpop.f32.mrb[45].mxu0 }
 0x644   :  { %v1805_v48 = vmax.f32 %v1800_v34, %v1779_v47  ;;  %v3617_v49 = vpop.f32.mrb[46].mxu0 }
 0x645   :  { %v1808_v50 = vmax.f32 %v1803_v38, %v3617_v49  ;;  %v1782_v51 = vpop.f32.mrb[47].mxu0 }
 0x646   :  { %v1809_v52 = vpack.c.bf16 %v1805_v48, %v1804_v42  ;;  %v1806_v53 = vmax.f32 %v1801_v40, %v1782_v51 }
 0x647   :  { %v1811_v54 = vpack.c.bf16 %v1808_v50, %v1808_v50 }
 0x648   :  { %v1810_v55 = vpack.c.bf16 %v1807_v46, %v1806_v53 }
 0x649   :  { %3874 = dma.done.wait [#allocation5], 18432 }
 0x64a   :  { %3875 = vsyncadd [#allocation5], 4294948864  ;;  %v3896_v56 = vmov 0.0   ;;  %vm3897_vm7 = vmmov 0   ;;  %v2009_v57 = vsel %vm1677_vm6, %v1811_v54, 0  ;;  %v3789_v58 = vld [vmem:[%s4507_s5] sm:$0xff]  }
 0x64b   :  { %3618 = vmatprep.subr.bf16.mxu1 %v3896_v56  ;;  %3624 = vmatprep.mubr.msk.bf16.mxu1 %vm3897_vm7, %v3896_v56  ;;  %vm1992_vm8 = vcmask 326656   ;;  %v1817_v59 = vld [vmem:[#allocation2 + $0x8] sm:$0xff]  ;;  %v1816_v60 = vld [vmem:[#allocation2] sm:$0xff]  ;;  %v1819_v61 = vld [vmem:[#allocation2 + $0x18] sm:$0xff] }
 0x64c   :  { %3619 = vmatpush3.bf16.msra.mxu1 %v1809_v52  ;;  %2092 = vmatprep.subr.bf16.mxu0 %v1817_v59  ;;  %v1818_v62 = vld [vmem:[#allocation2 + $0x10] sm:$0xff]  ;;  %v1821_v63 = vld [vmem:[#allocation2 + $0x28] sm:$0xff]  ;;  %v1820_v1 = vld [vmem:[#allocation2 + $0x20] sm:$0xff] }
 0x64d   :  { %3620 = vmatprep.subr.bf16.mxu1 %v3896_v56  ;;  %2093 = vmatpush1.bf16.msra.mxu0 %v1816_v60  ;;  %v3790_v0 = vld [vmem:[%s4507_s5 + $0x8] sm:$0xff]   ;;  %v1823_v2 = vld [vmem:[#allocation2 + $0x38] sm:$0xff]  ;;  %v1822_v3 = vld [vmem:[#allocation2 + $0x30] sm:$0xff] }
 0x64e   :  { %2094 = vmatprep.subr.bf16.mxu0 %v1819_v61  ;;  %v1825_v4 = vld [vmem:[#allocation2 + $0x48] sm:$0xff]  ;;  %v3791_v5 = vld [vmem:[%s4507_s5 + $0x10] sm:$0xff]   ;;  %v1824_v6 = vld [vmem:[#allocation2 + $0x40] sm:$0xff] }
 0x64f   :  { %v1827_v7 = vld [vmem:[#allocation2 + $0x58] sm:$0xff]  ;;  %v1826_v8 = vld [vmem:[#allocation2 + $0x50] sm:$0xff]  ;;  %v1829_v9 = vld [vmem:[#allocation2 + $0x68] sm:$0xff] }
 0x650   :  { %3621 = vmatpush3.bf16.msra.mxu1 %v1810_v55  ;;  %v1828_v10 = vld [vmem:[#allocation2 + $0x60] sm:$0xff]  ;;  %v3792_v11 = vld [vmem:[%s4507_s5 + $0x18] sm:$0xff]   ;;  %v1830_v13 = vld [vmem:[#allocation2 + $0x70] sm:$0xff] }
 0x651   :  { %3622 = vmatprep.subr.bf16.mxu1 %v3896_v56  ;;  %2095 = vmatpush1.bf16.msra.mxu0 %v1818_v62  ;;  %v1831_v12 = vld [vmem:[#allocation2 + $0x78] sm:$0xff]  ;;  %v1833_v14 = vld [vmem:[#allocation2 + $0x88] sm:$0xff]  ;;  %v1832_v15 = vld [vmem:[#allocation2 + $0x80] sm:$0xff] }
 0x652   :  { %2096 = vmatprep.subr.bf16.mxu0 %v1821_v63  ;;  %v1835_v16 = vld [vmem:[#allocation2 + $0x98] sm:$0xff]  ;;  %v1834_v17 = vld [vmem:[#allocation2 + $0x90] sm:$0xff]  ;;  %v1837_v18 = vld [vmem:[#allocation2 + $0xa8] sm:$0xff] }
 0x653   :  { %v1836_v19 = vld [vmem:[#allocation2 + $0xa0] sm:$0xff]  ;;  %v1839_v20 = vld [vmem:[#allocation2 + $0xb8] sm:$0xff]  ;;  %v1838_v21 = vld [vmem:[#allocation2 + $0xb0] sm:$0xff] }
 0x654   :  { %3623 = vmatpush3.bf16.msra.mxu1 %v2009_v57  ;;  %v1841_v22 = vld [vmem:[#allocation2 + $0xc8] sm:$0xff]  ;;  %v1840_v23 = vld [vmem:[#allocation2 + $0xc0] sm:$0xff]  ;;  %v1843_v24 = vld [vmem:[#allocation2 + $0xd8] sm:$0xff] }
 0x655   :  { %2097 = vmatpush1.bf16.msra.mxu0 %v1820_v1  ;;  %v1842_v25 = vld [vmem:[#allocation2 + $0xd0] sm:$0xff]  ;;  %v1845_v26 = vld [vmem:[#allocation2 + $0xe8] sm:$0xff]  ;;  %v1844_v27 = vld [vmem:[#allocation2 + $0xe0] sm:$0xff] }
 0x656   :  { %2098 = vmatprep.subr.bf16.mxu0 %v1823_v2  ;;  %v1847_v28 = vld [vmem:[#allocation2 + $0xf8] sm:$0xff]  ;;  %v1846_v29 = vld [vmem:[#allocation2 + $0xf0] sm:$0xff]  ;;  %v1849_v30 = vld [vmem:[#allocation2 + $0x108] sm:$0xff] }
 0x657   :  { %3625 = vmatmul.mubr.msk.bf16.vlgmr.msra.gmra.mrb[56].mxu1 %vm1992_vm8, %v3789_v58  ;;  %v3793_v31 = vld [vmem:[%s4507_s5 + $0x20] ss:$0 sps:$4 sm:$0xff]   ;;  %v1851_v39 = vld [vmem:[#allocation2 + $0x118] sm:$0xff]  ;;  %v1850_v40 = vld [vmem:[#allocation2 + $0x110] sm:$0xff] }
 0x658   :  { %3628 = vmatprep.mubr.msk.bf16.mxu1 %vm3897_vm7, %v3896_v56  ;;  %v1848_v38 = vld [vmem:[#allocation2 + $0x100] sm:$0xff]  ;;  %v1853_v42 = vld [vmem:[#allocation2 + $0x128] sm:$0xff]  ;;  %v1855_v48 = vld [vmem:[#allocation2 + $0x138] sm:$0xff] }
 0x659   :  { %2099 = vmatpush1.bf16.msra.mxu0 %v1822_v3  ;;  %v1852_v47 = vld [vmem:[#allocation2 + $0x120] sm:$0xff]  ;;  %v1854_v49 = vld [vmem:[#allocation2 + $0x130] sm:$0xff]  ;;  %v1857_v51 = vld [vmem:[#allocation2 + $0x148] sm:$0xff] }
 0x65a   :  { %2100 = vmatprep.subr.bf16.mxu0 %v1825_v4  ;;  %v1856_v55 = vld [vmem:[#allocation2 + $0x140] sm:$0xff]  ;;  %v1858_v57 = vld [vmem:[#allocation2 + $0x150] sm:$0xff]  ;;  %v1861_v58 = vld [vmem:[#allocation2 + $0x168] sm:$0xff] }
 0x65b   :  { %v1860_v59 = vld [vmem:[#allocation2 + $0x160] sm:$0xff]  ;;  %v1863_v60 = vld [vmem:[#allocation2 + $0x178] sm:$0xff]  ;;  %v1862_v61 = vld [vmem:[#allocation2 + $0x170] sm:$0xff] }
 0x65c   :  { %v1865_v62 = vld [vmem:[#allocation2 + $0x188] sm:$0xff]  ;;  %v1864_v63 = vld [vmem:[#allocation2 + $0x180] sm:$0xff]  ;;  %v1866_v1 = vld [vmem:[#allocation2 + $0x190] sm:$0xff] }
 0x65d   :  { %2101 = vmatpush1.bf16.msra.mxu0 %v1824_v6  ;;  %v1869_v2 = vld [vmem:[#allocation2 + $0x1a8] sm:$0xff]  ;;  %v1868_v3 = vld [vmem:[#allocation2 + $0x1a0] sm:$0xff]  ;;  %v1871_v4 = vld [vmem:[#allocation2 + $0x1b8] sm:$0xff] }
 0x65e   :  { %2102 = vmatprep.subr.bf16.mxu0 %v1827_v7  ;;  %v1873_v6 = vld [vmem:[#allocation2 + $0x1c8] sm:$0xff]  ;;  %v1872_v7 = vld [vmem:[#allocation2 + $0x1c0] sm:$0xff] }
 0x65f   :  { %3629 = vmatmul.mubr.msk.bf16.gmra.mrb[60].mxu1 %vm1992_vm8, %v3790_v0  ;;  %v1867_v0 = vld [vmem:[#allocation2 + $0x198] sm:$0xff] }
 0x660   :  { %3632 = vmatprep.mubr.msk.bf16.mxu1 %vm3897_vm7, %v3896_v56 }
 0x661   :  { %2103 = vmatpush1.bf16.msra.mxu0 %v1826_v8  ;;  %v1875_v8 = vld [vmem:[#allocation2 + $0x1d8] sm:$0xff] }
 0x662   :  { %2104 = vmatprep.subr.bf16.mxu0 %v1829_v9  ;;  %v1874_v9 = vld [vmem:[#allocation2 + $0x1d0] sm:$0xff] }
 0x665   :  { %2105 = vmatpush1.bf16.msra.mxu0 %v1828_v10  ;;  %v1877_v10 = vld [vmem:[#allocation2 + $0x1e8] sm:$0xff] }
 0x666   :  { %2106 = vmatprep.subr.bf16.mxu0 %v1831_v12  ;;  %v1876_v12 = vld [vmem:[#allocation2 + $0x1e0] sm:$0xff] }
 0x667   :  { %3633 = vmatmul.mubr.msk.bf16.gmra.mrb[64].mxu1 %vm1992_vm8, %v3791_v5  ;;  %v1870_v5 = vld [vmem:[#allocation2 + $0x1b0] sm:$0xff] }
 0x668   :  { %3636 = vmatprep.mubr.msk.bf16.mxu1 %vm3897_vm7, %v3896_v56 }
 0x669   :  { %2107 = vmatpush1.bf16.msra.mxu0 %v1830_v13 }
 0x66a   :  { %2108 = vmatprep.subr.bf16.mxu0 %v1833_v14  ;;  %v1879_v14 = vld [vmem:[#allocation2 + $0x1f8] sm:$0xff] }
 0x66d   :  { %2109 = vmatpush1.bf16.msra.mxu0 %v1832_v15 }
 0x66e   :  { %2110 = vmatprep.subr.bf16.mxu0 %v1835_v16  ;;  %v1878_v16 = vld [vmem:[#allocation2 + $0x1f0] sm:$0xff] }
 0x66f   :  { %3637 = vmatmul.mubr.msk.bf16.gmra.mrb[68].mxu1 %vm1992_vm8, %v3792_v11 }
 0x670   :  { %3640 = vmatprep.mubr.msk.bf16.mxu1 %vm3897_vm7, %v3896_v56  ;;  %v1859_v56 = vld [vmem:[#allocation2 + $0x158] sm:$0xff] }
 0x671   :  { %2111 = vmatpush1.bf16.msra.mxu0 %v1834_v17 }
 0x672   :  { %2112 = vmatprep.subr.bf16.mxu0 %v1837_v18  ;;  %v1881_v18 = vld [vmem:[#allocation2 + $0x208] sm:$0xff] }
 0x675   :  { %2113 = vmatpush1.bf16.msra.mxu0 %v1836_v19 }
 0x676   :  { %2114 = vmatprep.subr.bf16.mxu0 %v1839_v20 }
 0x677   :  { %3641 = vmatmul.mubr.msk.bf16.gmra.mrb[72].mxu1 %vm1992_vm8, %v3793_v31  ;;  %v1890_v31 = vld [vmem:[#allocation2 + $0x250] sm:$0xff] }
 0x679   :  { %2115 = vmatpush1.bf16.msra.mxu0 %v1838_v21  ;;  %v1880_v21 = vld [vmem:[#allocation2 + $0x200] sm:$0xff] }
 0x67a   :  { %2116 = vmatprep.subr.bf16.mxu0 %v1841_v22  ;;  %v1883_v22 = vld [vmem:[#allocation2 + $0x218] sm:$0xff] }
 0x67d   :  { %2117 = vmatpush1.bf16.msra.mxu0 %v1840_v23  ;;  %v1882_v23 = vld [vmem:[#allocation2 + $0x210] sm:$0xff] }
 0x67e   :  { %2118 = vmatprep.subr.bf16.mxu0 %v1843_v24  ;;  %v1885_v24 = vld [vmem:[#allocation2 + $0x228] sm:$0xff] }
 0x681   :  { %2119 = vmatpush1.bf16.msra.mxu0 %v1842_v25  ;;  %v1884_v25 = vld [vmem:[#allocation2 + $0x220] sm:$0xff] }
 0x682   :  { %2120 = vmatprep.subr.bf16.mxu0 %v1845_v26  ;;  %v1887_v26 = vld [vmem:[#allocation2 + $0x238] sm:$0xff] }
 0x685   :  { %2121 = vmatpush1.bf16.msra.mxu0 %v1844_v27  ;;  %v1886_v27 = vld [vmem:[#allocation2 + $0x230] sm:$0xff] }
 0x686   :  { %2122 = vmatprep.subr.bf16.mxu0 %v1847_v28  ;;  %v1889_v28 = vld [vmem:[#allocation2 + $0x248] sm:$0xff] }
 0x689   :  { %2123 = vmatpush1.bf16.msra.mxu0 %v1846_v29  ;;  %v1888_v29 = vld [vmem:[#allocation2 + $0x240] sm:$0xff] }
 0x68a   :  { %2133 = vmatprep.subr.bf16.mxu0 %v1849_v30  ;;  %v1891_v30 = vld [vmem:[#allocation2 + $0x258] sm:$0xff] }
 0x72a   :  { %v2045_v32 = vpop.f32.mrb[56].mxu1 }
 0x72b   :  { %v3626_v33 = vpop.f32.mrb[57].mxu1  ;;  %v2083_v37 = vpack.c.bf16 %v2045_v32, %v2045_v32  ;;  %v1893_v32 = vld [vmem:[#allocation2 + $0x268] sm:$0xff] }
 0x72c   :  { %v2048_v34 = vpop.f32.mrb[58].mxu1  ;;  %v1892_v33 = vld [vmem:[#allocation2 + $0x260] sm:$0xff] }
 0x72d   :  { %v3627_v35 = vpop.f32.mrb[59].mxu1  ;;  %v2084_v36 = vpack.c.bf16 %v2048_v34, %v2048_v34  ;;  %v1895_v34 = vld [vmem:[#allocation2 + $0x278] sm:$0xff] }
 0x72e   :  { %v1894_v35 = vld [vmem:[#allocation2 + $0x270] sm:$0xff] }
 0x72f   :  { %2124 = vmatprep.mubr.bf16.mxu0 %v2084_v36 }
 0x730   :  { %2125 = vmatmul.mubr.bf16.vlgmr.msra.gmra.mrb[48].mxu0 %v2083_v37  ;;  %v1897_v37 = vld [vmem:[#allocation2 + $0x288] sm:$0xff] }
 0x731   :  { %2134 = vmatpush1.bf16.msra.mxu0 %v1848_v38 }
 0x732   :  { %2135 = vmatprep.subr.bf16.mxu0 %v1851_v39  ;;  %v4303_v41 = vpop.f32.mrb[60].mxu1 }
 0x733   :  { %v3630_v43 = vpop.f32.mrb[61].mxu1  ;;  %v2085_v20 = vpack.c.bf16 %v4303_v41, %v4303_v41  ;;  %v1896_v41 = vld [vmem:[#allocation2 + $0x280] sm:$0xff] }
 0x734   :  { %v2056_v44 = vpop.f32.mrb[62].mxu1  ;;  %v1898_v43 = vld [vmem:[#allocation2 + $0x290] sm:$0xff] }
 0x735   :  { %2136 = vmatpush1.bf16.msra.mxu0 %v1850_v40  ;;  %v2086_v45 = vpack.c.bf16 %v2056_v44, %v2056_v44  ;;  %v3631_v46 = vpop.f32.mrb[63].mxu1  ;;  %v1901_v44 = vld [vmem:[#allocation2 + $0x2a8] sm:$0xff] }
 0x736   :  { %2137 = vmatprep.subr.bf16.mxu0 %v1853_v42  ;;  %v1899_v42 = vld [vmem:[#allocation2 + $0x298] sm:$0xff] }
 0x737   :  { %2165 = vmatprep.mubr.bf16.mxu0 %v2086_v45  ;;  %v1900_v45 = vld [vmem:[#allocation2 + $0x2a0] sm:$0xff]  ;;  %v1903_v46 = vld [vmem:[#allocation2 + $0x2b8] sm:$0xff] }
 0x739   :  { %2138 = vmatpush1.bf16.msra.mxu0 %v1852_v47  ;;  %v1902_v47 = vld [vmem:[#allocation2 + $0x2b0] sm:$0xff] }
 0x73a   :  { %2139 = vmatprep.subr.bf16.mxu0 %v1855_v48  ;;  %v4305_v50 = vpop.f32.mrb[64].mxu1  ;;  %v1905_v48 = vld [vmem:[#allocation2 + $0x2c8] sm:$0xff] }
 0x73b   :  { %v3634_v52 = vpop.f32.mrb[65].mxu1 }
 0x73c   :  { %v2064_v53 = vpop.f32.mrb[66].mxu1  ;;  %v1906_v52 = vld [vmem:[#allocation2 + $0x2d0] sm:$0xff] }
 0x73d   :  { %2140 = vmatpush1.bf16.msra.mxu0 %v1854_v49  ;;  %v3635_v54 = vpop.f32.mrb[67].mxu1  ;;  %v2088_v19 = vpack.c.bf16 %v2064_v53, %v2064_v53  ;;  %v1904_v49 = vld [vmem:[#allocation2 + $0x2c0] sm:$0xff]  ;;  %v1909_v53 = vld [vmem:[#allocation2 + $0x2e8] sm:$0xff] }
 0x73e   :  { %2141 = vmatprep.subr.bf16.mxu0 %v1857_v51  ;;  %v1907_v51 = vld [vmem:[#allocation2 + $0x2d8] sm:$0xff]  ;;  %v1908_v54 = vld [vmem:[#allocation2 + $0x2e0] sm:$0xff] }
 0x741   :  { %2142 = vmatpush1.bf16.msra.mxu0 %v1856_v55  ;;  %v1911_v55 = vld [vmem:[#allocation2 + $0x2f8] sm:$0xff] }
 0x742   :  { %2143 = vmatprep.subr.bf16.mxu0 %v1859_v56  ;;  %v4307_v11 = vpop.f32.mrb[68].mxu1  ;;  %v1910_v56 = vld [vmem:[#allocation2 + $0x2f0] sm:$0xff] }
 0x743   :  { %v3638_v13 = vpop.f32.mrb[69].mxu1 }
 0x744   :  { %v4309_v15 = vpop.f32.mrb[70].mxu1  ;;  %v1931_v13 = vld [vmem:[#allocation2 + $0x398] sm:$0xff] }
 0x745   :  { %2144 = vmatpush1.bf16.msra.mxu0 %v1858_v57  ;;  %v3639_v17 = vpop.f32.mrb[71].mxu1  ;;  %v1913_v57 = vld [vmem:[#allocation2 + $0x308] sm:$0xff] }
 0x746   :  { %2145 = vmatprep.subr.bf16.mxu0 %v1861_v58  ;;  %v2090_v58 = vpack.c.bf16 %v4309_v15, %v4309_v15  ;;  %v1933_v15 = vld [vmem:[#allocation2 + $0x3a8] sm:$0xff]  ;;  %v1935_v17 = vld [vmem:[#allocation2 + $0x3b8] sm:$0xff] }
 0x749   :  { %2146 = vmatpush1.bf16.msra.mxu0 %v1860_v59  ;;  %v2087_v59 = vpack.c.bf16 %v4305_v50, %v4305_v50  ;;  %v1920_v50 = vld [vmem:[#allocation2 + $0x340] sm:$0xff] }
 0x74a   :  { %2147 = vmatprep.subr.bf16.mxu0 %v1863_v60  ;;  %v4313_v36 = vpop.f32.mrb[72].mxu1  ;;  %v1912_v60 = vld [vmem:[#allocation2 + $0x300] sm:$0xff] }
 0x74b   :  { %v3642_v38 = vpop.f32.mrb[73].mxu1 }
 0x74c   :  { %v2080_v39 = vpop.f32.mrb[74].mxu1  ;;  %v1953_v38 = vld [vmem:[#allocation2 + $0x448] sm:$0xff] }
 0x74d   :  { %2148 = vmatpush1.bf16.msra.mxu0 %v1862_v61  ;;  %v3643_v40 = vpop.f32.mrb[75].mxu1  ;;  %v1915_v61 = vld [vmem:[#allocation2 + $0x318] sm:$0xff] }
 0x74e   :  { %2149 = vmatprep.subr.bf16.mxu0 %v1865_v62  ;;  %v1914_v62 = vld [vmem:[#allocation2 + $0x310] sm:$0xff]  ;;  %v1955_v39 = vld [vmem:[#allocation2 + $0x458] sm:$0xff] }
 0x74f   :  { %v1954_v40 = vld [vmem:[#allocation2 + $0x450] sm:$0xff] }
 0x751   :  { %2150 = vmatpush1.bf16.msra.mxu0 %v1864_v63  ;;  %v1917_v63 = vld [vmem:[#allocation2 + $0x328] sm:$0xff] }
 0x752   :  { %2151 = vmatprep.subr.bf16.mxu0 %v1867_v0  ;;  %v1916_v0 = vld [vmem:[#allocation2 + $0x320] sm:$0xff] }
 0x755   :  { %2152 = vmatpush1.bf16.msra.mxu0 %v1866_v1  ;;  %v1919_v1 = vld [vmem:[#allocation2 + $0x338] sm:$0xff] }
 0x756   :  { %2153 = vmatprep.subr.bf16.mxu0 %v1869_v2  ;;  %v1918_v2 = vld [vmem:[#allocation2 + $0x330] sm:$0xff] }
 0x759   :  { %2154 = vmatpush1.bf16.msra.mxu0 %v1868_v3  ;;  %v1921_v3 = vld [vmem:[#allocation2 + $0x348] sm:$0xff] }
 0x75a   :  { %2155 = vmatprep.subr.bf16.mxu0 %v1871_v4  ;;  %v1923_v4 = vld [vmem:[#allocation2 + $0x358] sm:$0xff] }
 0x75d   :  { %2156 = vmatpush1.bf16.msra.mxu0 %v1870_v5  ;;  %v1922_v5 = vld [vmem:[#allocation2 + $0x350] sm:$0xff] }
 0x75e   :  { %2157 = vmatprep.subr.bf16.mxu0 %v1873_v6  ;;  %v1925_v6 = vld [vmem:[#allocation2 + $0x368] sm:$0xff] }
 0x761   :  { %2158 = vmatpush1.bf16.msra.mxu0 %v1872_v7  ;;  %v1924_v7 = vld [vmem:[#allocation2 + $0x360] sm:$0xff] }
 0x762   :  { %2159 = vmatprep.subr.bf16.mxu0 %v1875_v8  ;;  %v1927_v8 = vld [vmem:[#allocation2 + $0x378] sm:$0xff] }
 0x765   :  { %2160 = vmatpush1.bf16.msra.mxu0 %v1874_v9  ;;  %v1926_v9 = vld [vmem:[#allocation2 + $0x370] sm:$0xff] }
 0x766   :  { %2161 = vmatprep.subr.bf16.mxu0 %v1877_v10  ;;  %v1929_v10 = vld [vmem:[#allocation2 + $0x388] sm:$0xff] }
 0x769   :  { %2162 = vmatpush1.bf16.msra.mxu0 %v1876_v12  ;;  %v1928_v12 = vld [vmem:[#allocation2 + $0x380] sm:$0xff] }
 0x76a   :  { %2163 = vmatprep.subr.bf16.mxu0 %v1879_v14  ;;  %v1930_v14 = vld [vmem:[#allocation2 + $0x390] sm:$0xff] }
 0x76d   :  { %2164 = vmatpush1.bf16.msra.mxu0 %v1878_v16  ;;  %v1932_v16 = vld [vmem:[#allocation2 + $0x3a0] sm:$0xff] }
 0x76e   :  { %2174 = vmatprep.subr.bf16.mxu0 %v1881_v18  ;;  %v1934_v18 = vld [vmem:[#allocation2 + $0x3b0] sm:$0xff] }
 0x770   :  { %2166 = vmatmul.mubr.bf16.vlgmr.msra.gmra.mrb[48].mxu0 %v2085_v20  ;;  %v1936_v20 = vld [vmem:[#allocation2 + $0x3c0] sm:$0xff] }
 0x771   :  { %2175 = vmatpush1.bf16.msra.mxu0 %v1880_v21  ;;  %2206 = vmatprep.mubr.bf16.mxu0 %v2088_v19  ;;  %v1937_v19 = vld [vmem:[#allocation2 + $0x3c8] sm:$0xff]  ;;  %v1939_v21 = vld [vmem:[#allocation2 + $0x3d8] sm:$0xff] }
 0x772   :  { %2176 = vmatprep.subr.bf16.mxu0 %v1883_v22  ;;  %v1938_v22 = vld [vmem:[#allocation2 + $0x3d0] sm:$0xff] }
 0x775   :  { %2177 = vmatpush1.bf16.msra.mxu0 %v1882_v23  ;;  %v1941_v23 = vld [vmem:[#allocation2 + $0x3e8] sm:$0xff] }
 0x776   :  { %2178 = vmatprep.subr.bf16.mxu0 %v1885_v24  ;;  %v1940_v24 = vld [vmem:[#allocation2 + $0x3e0] sm:$0xff] }
 0x779   :  { %2179 = vmatpush1.bf16.msra.mxu0 %v1884_v25  ;;  %v1943_v25 = vld [vmem:[#allocation2 + $0x3f8] sm:$0xff] }
 0x77a   :  { %2180 = vmatprep.subr.bf16.mxu0 %v1887_v26  ;;  %v1942_v26 = vld [vmem:[#allocation2 + $0x3f0] sm:$0xff] }
 0x77d   :  { %2181 = vmatpush1.bf16.msra.mxu0 %v1886_v27  ;;  %v1945_v27 = vld [vmem:[#allocation2 + $0x408] sm:$0xff] }
 0x77e   :  { %2182 = vmatprep.subr.bf16.mxu0 %v1889_v28  ;;  %v2089_v28 = vpack.c.bf16 %v4307_v11, %v4307_v11  ;;  %v1952_v11 = vld [vmem:[#allocation2 + $0x440] sm:$0xff] }
 0x781   :  { %2183 = vmatpush1.bf16.msra.mxu0 %v1888_v29  ;;  %v1944_v29 = vld [vmem:[#allocation2 + $0x400] sm:$0xff] }
 0x782   :  { %2184 = vmatprep.subr.bf16.mxu0 %v1891_v30  ;;  %v1947_v30 = vld [vmem:[#allocation2 + $0x418] sm:$0xff] }
 0x785   :  { %2185 = vmatpush1.bf16.msra.mxu0 %v1890_v31  ;;  %v3898_v31 = vmov 0  }
 0x786   :  { %2186 = vmatprep.subr.bf16.mxu0 %v1893_v32  ;;  %v1946_v32 = vld [vmem:[#allocation2 + $0x410] sm:$0xff] }
 0x789   :  { %2187 = vmatpush1.bf16.msra.mxu0 %v1892_v33  ;;  %v1949_v33 = vld [vmem:[#allocation2 + $0x428] sm:$0xff] }
 0x78a   :  { %2188 = vmatprep.subr.bf16.mxu0 %v1895_v34  ;;  %v1948_v34 = vld [vmem:[#allocation2 + $0x420] sm:$0xff] }
 0x78d   :  { %2189 = vmatpush1.bf16.msra.mxu0 %v1894_v35  ;;  %v1951_v35 = vld [vmem:[#allocation2 + $0x438] sm:$0xff] }
 0x78e   :  { %2190 = vmatprep.subr.bf16.mxu0 %v1897_v37  ;;  %v1950_v37 = vld [vmem:[#allocation2 + $0x430] sm:$0xff] }
 0x791   :  { %2191 = vmatpush1.bf16.msra.mxu0 %v1896_v41  ;;  %v1957_v41 = vld [vmem:[#allocation2 + $0x468] sm:$0xff] }
 0x792   :  { %2192 = vmatprep.subr.bf16.mxu0 %v1899_v42  ;;  %v1956_v42 = vld [vmem:[#allocation2 + $0x460] sm:$0xff] }
 0x795   :  { %2193 = vmatpush1.bf16.msra.mxu0 %v1898_v43  ;;  %v1959_v43 = vld [vmem:[#allocation2 + $0x478] sm:$0xff] }
 0x796   :  { %2194 = vmatprep.subr.bf16.mxu0 %v1901_v44  ;;  %v1958_v44 = vld [vmem:[#allocation2 + $0x470] sm:$0xff] }
 0x799   :  { %2195 = vmatpush1.bf16.msra.mxu0 %v1900_v45  ;;  %v2091_v45 = vpack.c.bf16 %v4313_v36, %v4313_v36 }
 0x79a   :  { %2196 = vmatprep.subr.bf16.mxu0 %v1903_v46 }
 0x79d   :  { %2197 = vmatpush1.bf16.msra.mxu0 %v1902_v47 }
 0x79e   :  { %2198 = vmatprep.subr.bf16.mxu0 %v1905_v48 }
 0x7a1   :  { %2199 = vmatpush1.bf16.msra.mxu0 %v1904_v49 }
 0x7a2   :  { %2200 = vmatprep.subr.bf16.mxu0 %v1907_v51 }
 0x7a5   :  { %2201 = vmatpush1.bf16.msra.mxu0 %v1906_v52 }
 0x7a6   :  { %2202 = vmatprep.subr.bf16.mxu0 %v1909_v53 }
 0x7a9   :  { %2203 = vmatpush1.bf16.msra.mxu0 %v1908_v54 }
 0x7aa   :  { %2204 = vmatprep.subr.bf16.mxu0 %v1911_v55 }
 0x7ad   :  { %2205 = vmatpush1.bf16.msra.mxu0 %v1910_v56 }
 0x7ae   :  { %2215 = vmatprep.subr.bf16.mxu0 %v1913_v57 }
 0x7b0   :  { %2207 = vmatmul.mubr.bf16.vlgmr.msra.gmra.mrb[48].mxu0 %v2087_v59 }
 0x7b1   :  { %2216 = vmatpush1.bf16.msra.mxu0 %v1912_v60  ;;  %2247 = vmatprep.mubr.bf16.mxu0 %v2090_v58 }
 0x7b2   :  { %2217 = vmatprep.subr.bf16.mxu0 %v1915_v61 }
 0x7b5   :  { %2218 = vmatpush1.bf16.msra.mxu0 %v1914_v62 }
 0x7b6   :  { %2219 = vmatprep.subr.bf16.mxu0 %v1917_v63 }
 0x7b9   :  { %2220 = vmatpush1.bf16.msra.mxu0 %v1916_v0 }
 0x7ba   :  { %2221 = vmatprep.subr.bf16.mxu0 %v1919_v1 }
 0x7bd   :  { %2222 = vmatpush1.bf16.msra.mxu0 %v1918_v2 }
 0x7be   :  { %2223 = vmatprep.subr.bf16.mxu0 %v1921_v3 }
 0x7c1   :  { %2224 = vmatpush1.bf16.msra.mxu0 %v1920_v50 }
 0x7c2   :  { %2225 = vmatprep.subr.bf16.mxu0 %v1923_v4 }
 0x7c5   :  { %2226 = vmatpush1.bf16.msra.mxu0 %v1922_v5 }
 0x7c6   :  { %2227 = vmatprep.subr.bf16.mxu0 %v1925_v6 }
 0x7c9   :  { %2228 = vmatpush1.bf16.msra.mxu0 %v1924_v7 }
 0x7ca   :  { %2229 = vmatprep.subr.bf16.mxu0 %v1927_v8 }
 0x7cd   :  { %2230 = vmatpush1.bf16.msra.mxu0 %v1926_v9 }
 0x7ce   :  { %2231 = vmatprep.subr.bf16.mxu0 %v1929_v10 }
 0x7d1   :  { %2232 = vmatpush1.bf16.msra.mxu0 %v1928_v12 }
 0x7d2   :  { %2233 = vmatprep.subr.bf16.mxu0 %v1931_v13 }
 0x7d5   :  { %2234 = vmatpush1.bf16.msra.mxu0 %v1930_v14 }
 0x7d6   :  { %2235 = vmatprep.subr.bf16.mxu0 %v1933_v15 }
 0x7d9   :  { %2236 = vmatpush1.bf16.msra.mxu0 %v1932_v16 }
 0x7da   :  { %2237 = vmatprep.subr.bf16.mxu0 %v1935_v17 }
 0x7dd   :  { %2238 = vmatpush1.bf16.msra.mxu0 %v1934_v18 }
 0x7de   :  { %2239 = vmatprep.subr.bf16.mxu0 %v1937_v19 }
 0x7e1   :  { %2240 = vmatpush1.bf16.msra.mxu0 %v1936_v20 }
 0x7e2   :  { %2241 = vmatprep.subr.bf16.mxu0 %v1939_v21 }
 0x7e5   :  { %2242 = vmatpush1.bf16.msra.mxu0 %v1938_v22 }
 0x7e6   :  { %2243 = vmatprep.subr.bf16.mxu0 %v1941_v23 }
 0x7e9   :  { %2244 = vmatpush1.bf16.msra.mxu0 %v1940_v24 }
 0x7ea   :  { %2245 = vmatprep.subr.bf16.mxu0 %v1943_v25 }
 0x7ed   :  { %2246 = vmatpush1.bf16.msra.mxu0 %v1942_v26  ;;  %v3899_v26 = vmov 1966171168  }
 0x7ee   :  { %2256 = vmatprep.subr.bf16.mxu0 %v1945_v27  ;;  %v2347_v27 = vunpack.c.l.s4 %v3899_v26 }
 0x7f0   :  { %2248 = vmatmul.mubr.bf16.vlgmr.msra.gmra.mrb[48].mxu0 %v2089_v28  ;;  %v2349_v28 = vlaneseq }
 0x7f1   :  { %2257 = vmatpush1.bf16.msra.mxu0 %v1944_v29  ;;  %2288 = vmatprep.mubr.bf16.mxu0 %v3898_v31  ;;  %v2348_v29 = vunpack.c.0.s8 %v2347_v27 }
 0x7f2   :  { %2258 = vmatprep.subr.bf16.mxu0 %v1947_v30  ;;  %v4337_v30 = vshrl.u32 %v2349_v28, 7 }
 0x7f5   :  { %2259 = vmatpush1.bf16.msra.mxu0 %v1946_v32  ;;  %v4340_v32 = vsub.s32 %v2348_v29, %v4337_v30 }
 0x7f6   :  { %2260 = vmatprep.subr.bf16.mxu0 %v1949_v33 }
 0x7f9   :  { %2261 = vmatpush1.bf16.msra.mxu0 %v1948_v34 }
 0x7fa   :  { %2262 = vmatprep.subr.bf16.mxu0 %v1951_v35 }
 0x7fd   :  { %2263 = vmatpush1.bf16.msra.mxu0 %v1950_v37  ;;  %v3261_v37 = vld [vmem:[%s4510_s8 + $0x4] ss:$8 sm:$0x3] }
 0x7fe   :  { %2264 = vmatprep.subr.bf16.mxu0 %v1953_v38 }
 0x801   :  { %2265 = vmatpush1.bf16.msra.mxu0 %v1952_v11  ;;  %v4348_v11 = vsub.s32 0, %v4337_v30 }
 0x802   :  { %2266 = vmatprep.subr.bf16.mxu0 %v1955_v39  ;;  %v4351_v39 = vsub.s32 1, %v4337_v30 }
 0x805   :  { %2267 = vmatpush1.bf16.msra.mxu0 %v1954_v40 }
 0x806   :  { %2268 = vmatprep.subr.bf16.mxu0 %v1957_v41 }
 0x809   :  { %2269 = vmatpush1.bf16.msra.mxu0 %v1956_v42 }
 0x80a   :  { %2270 = vmatprep.subr.bf16.mxu0 %v1959_v43 }
 0x80d   :  { %2271 = vmatpush1.bf16.msra.mxu0 %v1958_v44 }
 0x810   :  { %2289 = vmatmul.mubr.bf16.vlgmr.msra.gmra.mrb[48].mxu0 %v2091_v45 }
 0x8e3   :  { %v4323_v46 = vpop.f32.mrb[48].mxu0 }
 0x8e4   :  { %v2301_v47 = vsel %vm1677_vm6, %v4323_v46, 0.0  ;;  %v2317_v48 = vmul.f32 %v4323_v46, %v4323_v46  ;;  %v4329_v49 = vpop.f32.mrb[49].mxu0 }
 0x8e5   :  { %v2302_v51 = vrot.slane %v2301_v47, 4  ;;  %v2308_v52 = vsel %vm1677_vm6, %v4329_v49, 0.0  ;;  %v2318_v53 = vmul.f32 %v4329_v49, %v4329_v49  ;;  %v2294_v36 = vpop.f32.mrb[50].mxu0 }
 0x8e6   :  { %v2319_v54 = vsel %vm1677_vm6, %v2317_v48, 0.0  ;;  %v2309_v55 = vrot.slane %v2308_v52, 4  ;;  %v2295_v56 = vpop.f32.mrb[51].mxu0 }
 0x8e7   :  { %v2303_v57 = vadd.f32 %v2302_v51, %v2301_v47  ;;  %v2320_v58 = vrot.slane %v2319_v54, 4  ;;  %v2326_v59 = vsel %vm1677_vm6, %v2318_v53, 0.0 }
 0x8e8   :  { %v2310_v60 = vadd.f32 %v2309_v55, %v2308_v52  ;;  %v2327_v61 = vrot.slane %v2326_v59, 4  ;;  %v3262_v52 = vld [vmem:[%s4510_s8 + $0x5] ss:$8 sm:$0x3] }
 0x8e9   :  { %v2304_v62 = vrot.slane %v2303_v57, 2  ;;  %v2321_v63 = vadd.f32 %v2320_v58, %v2319_v54 }
 0x8ea   :  { %v2311_v0 = vrot.slane %v2310_v60, 2  ;;  %v2328_v1 = vadd.f32 %v2327_v61, %v2326_v59 }
 0x8eb   :  { %v2305_v2 = vadd.f32 %v2304_v62, %v2303_v57  ;;  %v2322_v3 = vrot.slane %v2321_v63, 2 }
 0x8ec   :  { %v2312_v50 = vadd.f32 %v2311_v0, %v2310_v60  ;;  %v2329_v4 = vrot.slane %v2328_v1, 2 }
 0x8ed   :  { %v2306_v5 = vrot.slane %v2305_v2, 1  ;;  %v2323_v6 = vadd.f32 %v2322_v3, %v2321_v63 }
 0x8ee   :  { %v2313_v7 = vrot.slane %v2312_v50, 1  ;;  %v2330_v8 = vadd.f32 %v2329_v4, %v2328_v1 }
 0x8ef   :  { %v2307_v9 = vadd.f32 %v2306_v5, %v2305_v2  ;;  %v2324_v10 = vrot.slane %v2323_v6, 1 }
 0x8f0   :  { %v2314_v12 = vadd.f32 %v2313_v7, %v2312_v50  ;;  %v2331_v13 = vrot.slane %v2330_v8, 1 }
 0x8f1   :  { %v2315_v14 = vmul.f32 0.25, %v2307_v9  ;;  %v2325_v15 = vadd.f32 %v2324_v10, %v2323_v6 }
 0x8f2   :  { %v2316_v16 = vmul.f32 0.25, %v2314_v12  ;;  %v2332_v17 = vadd.f32 %v2331_v13, %v2330_v8 }
 0x8f3   :  { %v2333_v18 = vmul.f32 0.25, %v2325_v15  ;;  %v2335_v19 = vmul.f32 %v2315_v14, %v2315_v14 }
 0x8f4   :  { %v2334_v20 = vmul.f32 0.25, %v2332_v17  ;;  %v2336_v21 = vmul.f32 %v2316_v16, %v2316_v16 }
 0x8f5   :  { %v2337_v22 = vsub.f32 %v2333_v18, %v2335_v19 }
 0x8f6   :  { %v2338_v23 = vsub.f32 %v2334_v20, %v2336_v21 }
 0x8f7   :  { %v2339_v24 = vadd.f32 1e-05, %v2337_v22 }
 0x8f8   :  { %v2340_v25 = vadd.f32 1e-05, %v2338_v23 }
 0x8f9   :  { %3794 = vrsqrt.f32 %v2339_v24 }
 0x8fa   :  { %3796 = vrsqrt.f32 %v2340_v25 }
 0x903   :  { %v3795_v31 = vpop.eup %3794 }
 0x904   :  { %v3797_v33 = vpop.eup %3796 }
 0x905   :  { %v2345_v34 = vcombine.low %v3795_v31, %v3797_v33 }
 0x907   :  { %v2352_v35 = vrot.slane %v2345_v34, %v4340_v32 }
 0x909   :  { %v2359_v38 = vrot.slane %v2352_v35, %v4340_v32 }
 0x90b   :  { %v2361_v40 = vmul.f32 %v3261_v37, %v2359_v38 }
 0x90d   :  { %v2366_v41 = vrot.slane %v2361_v40, %v4348_v11  ;;  %v2370_v42 = vrot.slane %v2361_v40, %v4351_v39 }
 0x90f   :  { %v2373_v43 = vmul.f32 %v2366_v41, %v2315_v14  ;;  %v2374_v44 = vmul.f32 %v2370_v42, %v2316_v16  ;;  %v2394_v45 = vmul.f32 %v2366_v41, %v4323_v46  ;;  %v2395_v47 = vmul.f32 %v2370_v42, %v4329_v49 }
 0x911   :  { %v2377_v48 = vcombine.low %v2373_v43, %v2374_v44 }
 0x913   :  { %v2384_v51 = vrot.slane %v2377_v48, %v4340_v32 }
 0x915   :  { %v2391_v53 = vrot.slane %v2384_v51, %v4340_v32 }
 0x917   :  { %v2393_v36 = vsub.f32 %v3262_v52, %v2391_v53 }
 0x919   :  { %v2400_v54 = vrot.slane %v2393_v36, %v4348_v11  ;;  %v2404_v55 = vrot.slane %v2393_v36, %v4351_v39 }
 0x91b   :  { %v2407_v56 = vadd.f32 %v2400_v54, %v2394_v45  ;;  %v2408_v57 = vadd.f32 %v2404_v55, %v2395_v47 }
 0x91d   :  { %v2409_v58 = vmax.f32 %v2407_v56, 0.0  ;;  %v2410_v46 = vmax.f32 %v2408_v57, 0.0 }
 0x91f   :  { %v4364_v59 = vpack.c.bf16 %v2409_v58, %v2409_v58  ;;  %v4366_v49 = vpack.c.bf16 %v2410_v46, %v2410_v46 }
 0x920   :  { %3876 = dma.done.wait [#allocation5 + $0x1], 8192 }
 0x921   :  { %3877 = vsyncadd [#allocation5 + $0x1], 4294959104  ;;  %2513 = vmatprep.mubr.bf16.mxu1 %v4366_v49  ;;  %v2418_v60 = vld [vmem:[#allocation3 + $0x8] sm:$0xff]  ;;  %v2417_v61 = vld [vmem:[#allocation3] sm:$0xff]  ;;  %vm2825_vm9 = vcmask 1040384  }
 0x922   :  { %v2422_v62 = vld [vmem:[#allocation3 + $0x28] sm:$0xff]  ;;  %2481 = vmatprep.subr.bf16.mxu1 %v2418_v60  ;;  %v2421_v63 = vld [vmem:[#allocation3 + $0x20] sm:$0xff]  ;;  %v2420_v28 = vld [vmem:[#allocation3 + $0x18] sm:$0xff]  ;;  %vm2826_vm10 = vsmask.f32 256 }
 0x923   :  { %2482 = vmatpush1.bf16.msra.mxu1 %v2417_v61  ;;  %v2426_v0 = vld [vmem:[#allocation3 + $0x48] sm:$0xff]  ;;  %v2425_v1 = vld [vmem:[#allocation3 + $0x40] sm:$0xff]  ;;  %v2419_v29 = vld [vmem:[#allocation3 + $0x10] sm:$0xff] }
 0x924   :  { %2483 = vmatprep.subr.bf16.mxu1 %v2422_v62  ;;  %v2430_v2 = vld [vmem:[#allocation3 + $0x68] sm:$0xff]  ;;  %v2429_v3 = vld [vmem:[#allocation3 + $0x60] sm:$0xff]  ;;  %v2424_v31 = vld [vmem:[#allocation3 + $0x38] sm:$0xff] }
 0x925   :  { %v2434_v50 = vld [vmem:[#allocation3 + $0x88] sm:$0xff]  ;;  %v2433_v4 = vld [vmem:[#allocation3 + $0x80] sm:$0xff]  ;;  %v2423_v33 = vld [vmem:[#allocation3 + $0x30] sm:$0xff] }
 0x926   :  { %v2438_v5 = vld [vmem:[#allocation3 + $0xa8] sm:$0xff]  ;;  %v2437_v6 = vld [vmem:[#allocation3 + $0xa0] sm:$0xff]  ;;  %v2428_v34 = vld [vmem:[#allocation3 + $0x58] sm:$0xff] }
 0x927   :  { %2484 = vmatpush1.bf16.msra.mxu1 %v2421_v63  ;;  %v2442_v7 = vld [vmem:[#allocation3 + $0xc8] sm:$0xff]  ;;  %v2441_v8 = vld [vmem:[#allocation3 + $0xc0] sm:$0xff]  ;;  %v2427_v35 = vld [vmem:[#allocation3 + $0x50] sm:$0xff] }
 0x928   :  { %2485 = vmatprep.subr.bf16.mxu1 %v2426_v0  ;;  %v2446_v9 = vld [vmem:[#allocation3 + $0xe8] sm:$0xff]  ;;  %v2445_v10 = vld [vmem:[#allocation3 + $0xe0] sm:$0xff]  ;;  %v2432_v37 = vld [vmem:[#allocation3 + $0x78] sm:$0xff] }
 0x929   :  { %v2450_v12 = vld [vmem:[#allocation3 + $0x108] sm:$0xff]  ;;  %v2449_v13 = vld [vmem:[#allocation3 + $0x100] sm:$0xff]  ;;  %v2431_v38 = vld [vmem:[#allocation3 + $0x70] sm:$0xff] }
 0x92a   :  { %v2454_v14 = vld [vmem:[#allocation3 + $0x128] sm:$0xff]  ;;  %v2453_v15 = vld [vmem:[#allocation3 + $0x120] sm:$0xff]  ;;  %v2436_v40 = vld [vmem:[#allocation3 + $0x98] sm:$0xff] }
 0x92b   :  { %2486 = vmatpush1.bf16.msra.mxu1 %v2425_v1  ;;  %v2458_v16 = vld [vmem:[#allocation3 + $0x148] sm:$0xff]  ;;  %v2457_v17 = vld [vmem:[#allocation3 + $0x140] sm:$0xff]  ;;  %v2435_v41 = vld [vmem:[#allocation3 + $0x90] sm:$0xff] }
 0x92c   :  { %2487 = vmatprep.subr.bf16.mxu1 %v2430_v2  ;;  %v2462_v18 = vld [vmem:[#allocation3 + $0x168] sm:$0xff]  ;;  %v2461_v19 = vld [vmem:[#allocation3 + $0x160] sm:$0xff]  ;;  %v2440_v42 = vld [vmem:[#allocation3 + $0xb8] sm:$0xff] }
 0x92d   :  { %v2466_v20 = vld [vmem:[#allocation3 + $0x188] sm:$0xff]  ;;  %v2465_v21 = vld [vmem:[#allocation3 + $0x180] sm:$0xff]  ;;  %v2439_v43 = vld [vmem:[#allocation3 + $0xb0] sm:$0xff] }
 0x92e   :  { %v2470_v22 = vld [vmem:[#allocation3 + $0x1a8] sm:$0xff]  ;;  %v2469_v23 = vld [vmem:[#allocation3 + $0x1a0] sm:$0xff]  ;;  %v2444_v44 = vld [vmem:[#allocation3 + $0xd8] sm:$0xff] }
 0x92f   :  { %2488 = vmatpush1.bf16.msra.mxu1 %v2429_v3  ;;  %v2474_v24 = vld [vmem:[#allocation3 + $0x1c8] sm:$0xff]  ;;  %v2473_v25 = vld [vmem:[#allocation3 + $0x1c0] sm:$0xff]  ;;  %v2443_v45 = vld [vmem:[#allocation3 + $0xd0] sm:$0xff] }
 0x930   :  { %2489 = vmatprep.subr.bf16.mxu1 %v2434_v50  ;;  %v2478_v26 = vld [vmem:[#allocation3 + $0x1e8] sm:$0xff]  ;;  %v2477_v27 = vld [vmem:[#allocation3 + $0x1e0] sm:$0xff]  ;;  %v2448_v47 = vld [vmem:[#allocation3 + $0xf8] sm:$0xff] }
 0x931   :  { %v2447_v48 = vld [vmem:[#allocation3 + $0xf0] sm:$0xff]  ;;  %v2452_v51 = vld [vmem:[#allocation3 + $0x118] sm:$0xff]  ;;  %vm4444_vm11 = vmand %vm2825_vm9, %vm2826_vm10 }
 0x932   :  { %v2451_v52 = vld [vmem:[#allocation3 + $0x110] sm:$0xff]  ;;  %v2456_v53 = vld [vmem:[#allocation3 + $0x138] sm:$0xff] }
 0x933   :  { %2490 = vmatpush1.bf16.msra.mxu1 %v2433_v4  ;;  %v2455_v36 = vld [vmem:[#allocation3 + $0x130] sm:$0xff]  ;;  %v2460_v54 = vld [vmem:[#allocation3 + $0x158] sm:$0xff] }
 0x934   :  { %2491 = vmatprep.subr.bf16.mxu1 %v2438_v5  ;;  %v2459_v55 = vld [vmem:[#allocation3 + $0x150] sm:$0xff]  ;;  %v2464_v56 = vld [vmem:[#allocation3 + $0x178] sm:$0xff] }
 0x935   :  { %v2463_v57 = vld [vmem:[#allocation3 + $0x170] sm:$0xff]  ;;  %v2468_v58 = vld [vmem:[#allocation3 + $0x198] sm:$0xff] }
 0x936   :  { %v2467_v46 = vld [vmem:[#allocation3 + $0x190] sm:$0xff]  ;;  %v2476_v61 = vld [vmem:[#allocation3 + $0x1d8] sm:$0xff] }
 0x937   :  { %2492 = vmatpush1.bf16.msra.mxu1 %v2437_v6  ;;  %v2471_v60 = vld [vmem:[#allocation3 + $0x1b0] sm:$0xff]  ;;  %v2480_v63 = vld [vmem:[#allocation3 + $0x1f8] sm:$0xff] }
 0x938   :  { %2493 = vmatprep.subr.bf16.mxu1 %v2442_v7  ;;  %v2475_v62 = vld [vmem:[#allocation3 + $0x1d0] sm:$0xff] }
 0x939   :  { %v2479_v0 = vld [vmem:[#allocation3 + $0x1f0] sm:$0xff] }
 0x93b   :  { %2494 = vmatpush1.bf16.msra.mxu1 %v2441_v8 }
 0x93c   :  { %2495 = vmatprep.subr.bf16.mxu1 %v2446_v9 }
 0x93f   :  { %2496 = vmatpush1.bf16.msra.mxu1 %v2445_v10 }
 0x940   :  { %2497 = vmatprep.subr.bf16.mxu1 %v2450_v12 }
 0x943   :  { %2498 = vmatpush1.bf16.msra.mxu1 %v2449_v13 }
 0x944   :  { %2499 = vmatprep.subr.bf16.mxu1 %v2454_v14 }
 0x947   :  { %2500 = vmatpush1.bf16.msra.mxu1 %v2453_v15 }
 0x948   :  { %2501 = vmatprep.subr.bf16.mxu1 %v2458_v16 }
 0x94b   :  { %2502 = vmatpush1.bf16.msra.mxu1 %v2457_v17 }
 0x94c   :  { %2503 = vmatprep.subr.bf16.mxu1 %v2462_v18 }
 0x94f   :  { %2504 = vmatpush1.bf16.msra.mxu1 %v2461_v19 }
 0x950   :  { %2505 = vmatprep.subr.bf16.mxu1 %v2466_v20 }
 0x953   :  { %2506 = vmatpush1.bf16.msra.mxu1 %v2465_v21 }
 0x954   :  { %2507 = vmatprep.subr.bf16.mxu1 %v2470_v22 }
 0x957   :  { %2508 = vmatpush1.bf16.msra.mxu1 %v2469_v23 }
 0x958   :  { %2509 = vmatprep.subr.bf16.mxu1 %v2474_v24 }
 0x95b   :  { %2510 = vmatpush1.bf16.msra.mxu1 %v2473_v25 }
 0x95c   :  { %2511 = vmatprep.subr.bf16.mxu1 %v2478_v26 }
 0x95f   :  { %2512 = vmatpush1.bf16.msra.mxu1 %v2477_v27 }
 0x960   :  { %2522 = vmatprep.subr.bf16.mxu1 %v2420_v28 }
 0x962   :  { %2514 = vmatmul.mubr.bf16.vlgmr.msra.gmra.mrb[76].mxu1 %v4364_v59 }
 0x963   :  { %2523 = vmatpush1.bf16.msra.mxu1 %v2419_v29  ;;  %2554 = vmatprep.mubr.bf16.mxu1 %v4366_v49  ;;  %v2472_v49 = vld [vmem:[#allocation3 + $0x1b8] sm:$0xff] }
 0x964   :  { %2524 = vmatprep.subr.bf16.mxu1 %v2424_v31 }
 0x967   :  { %2525 = vmatpush1.bf16.msra.mxu1 %v2423_v33 }
 0x968   :  { %2526 = vmatprep.subr.bf16.mxu1 %v2428_v34 }
 0x96b   :  { %2527 = vmatpush1.bf16.msra.mxu1 %v2427_v35 }
 0x96c   :  { %2528 = vmatprep.subr.bf16.mxu1 %v2432_v37 }
 0x96f   :  { %2529 = vmatpush1.bf16.msra.mxu1 %v2431_v38 }
 0x970   :  { %2530 = vmatprep.subr.bf16.mxu1 %v2436_v40 }
 0x973   :  { %2531 = vmatpush1.bf16.msra.mxu1 %v2435_v41 }
 0x974   :  { %2532 = vmatprep.subr.bf16.mxu1 %v2440_v42 }
 0x977   :  { %2533 = vmatpush1.bf16.msra.mxu1 %v2439_v43 }
 0x978   :  { %2534 = vmatprep.subr.bf16.mxu1 %v2444_v44 }
 0x97b   :  { %2535 = vmatpush1.bf16.msra.mxu1 %v2443_v45 }
 0x97c   :  { %2536 = vmatprep.subr.bf16.mxu1 %v2448_v47 }
 0x97f   :  { %2537 = vmatpush1.bf16.msra.mxu1 %v2447_v48 }
 0x980   :  { %2538 = vmatprep.subr.bf16.mxu1 %v2452_v51 }
 0x983   :  { %2539 = vmatpush1.bf16.msra.mxu1 %v2451_v52 }
 0x984   :  { %2540 = vmatprep.subr.bf16.mxu1 %v2456_v53 }
 0x987   :  { %2541 = vmatpush1.bf16.msra.mxu1 %v2455_v36 }
 0x988   :  { %2542 = vmatprep.subr.bf16.mxu1 %v2460_v54 }
 0x98b   :  { %2543 = vmatpush1.bf16.msra.mxu1 %v2459_v55 }
 0x98c   :  { %2544 = vmatprep.subr.bf16.mxu1 %v2464_v56 }
 0x98f   :  { %2545 = vmatpush1.bf16.msra.mxu1 %v2463_v57 }
 0x990   :  { %2546 = vmatprep.subr.bf16.mxu1 %v2468_v58 }
 0x993   :  { %2547 = vmatpush1.bf16.msra.mxu1 %v2467_v46 }
 0x994   :  { %2548 = vmatprep.subr.bf16.mxu1 %v2472_v49 }
 0x997   :  { %2549 = vmatpush1.bf16.msra.mxu1 %v2471_v60 }
 0x998   :  { %2550 = vmatprep.subr.bf16.mxu1 %v2476_v61 }
 0x99b   :  { %2551 = vmatpush1.bf16.msra.mxu1 %v2475_v62 }
 0x99c   :  { %2552 = vmatprep.subr.bf16.mxu1 %v2480_v63 }
 0x99f   :  { %2553 = vmatpush1.bf16.msra.mxu1 %v2479_v0 }
 0x9a2   :  { %2555 = vmatmul.mubr.bf16.vlgmr.msra.gmra.mrb[80].mxu1 %v4364_v59 }
 0xa35   :  { %v4372_v1 = vpop.f32.mrb[76].mxu1 }
 0xa36   :  { %v2567_v2 = vsel %vm1677_vm6, %v4372_v1, 0.0  ;;  %v2599_v3 = vmul.f32 %v4372_v1, %v4372_v1  ;;  %v4378_v50 = vpop.f32.mrb[77].mxu1 }
 0xa37   :  { %v2568_v4 = vrot.slane %v2567_v2, 4  ;;  %v2574_v5 = vsel %vm1677_vm6, %v4378_v50, 0.0  ;;  %v2600_v6 = vmul.f32 %v4378_v50, %v4378_v50  ;;  %v2519_v7 = vpop.f32.mrb[78].mxu1 }
 0xa38   :  { %v2603_v59 = vsel %vm1677_vm6, %v2599_v3, 0.0  ;;  %v2575_v8 = vrot.slane %v2574_v5, 4  ;;  %v2520_v9 = vpop.f32.mrb[79].mxu1 }
 0xa39   :  { %v2569_v10 = vadd.f32 %v2568_v4, %v2567_v2  ;;  %v2604_v12 = vrot.slane %v2603_v59, 4  ;;  %v2610_v13 = vsel %vm1677_vm6, %v2600_v6, 0.0 }
 0xa3a   :  { %v2576_v14 = vadd.f32 %v2575_v8, %v2574_v5  ;;  %v2611_v15 = vrot.slane %v2610_v13, 4 }
 0xa3b   :  { %v2570_v16 = vrot.slane %v2569_v10, 2  ;;  %v2605_v17 = vadd.f32 %v2604_v12, %v2603_v59 }
 0xa3c   :  { %v2577_v18 = vrot.slane %v2576_v14, 2  ;;  %v2612_v19 = vadd.f32 %v2611_v15, %v2610_v13 }
 0xa3d   :  { %v2571_v20 = vadd.f32 %v2570_v16, %v2569_v10  ;;  %v2606_v21 = vrot.slane %v2605_v17, 2 }
 0xa3e   :  { %v2578_v22 = vadd.f32 %v2577_v18, %v2576_v14  ;;  %v2613_v23 = vrot.slane %v2612_v19, 2 }
 0xa3f   :  { %v2572_v24 = vrot.slane %v2571_v20, 1  ;;  %v2607_v25 = vadd.f32 %v2606_v21, %v2605_v17 }
 0xa40   :  { %v2579_v26 = vrot.slane %v2578_v22, 1  ;;  %v2614_v27 = vadd.f32 %v2613_v23, %v2612_v19 }
 0xa41   :  { %v2573_v28 = vadd.f32 %v2572_v24, %v2571_v20  ;;  %v2608_v29 = vrot.slane %v2607_v25, 1 }
 0xa42   :  { %v2580_v31 = vadd.f32 %v2579_v26, %v2578_v22  ;;  %v2615_v33 = vrot.slane %v2614_v27, 1 }
 0xa43   :  { %v4386_v34 = vmul.f32 0.25, %v2573_v28  ;;  %v2609_v35 = vadd.f32 %v2608_v29, %v2607_v25 }
 0xa44   :  { %v4388_v37 = vmul.f32 0.25, %v2580_v31  ;;  %v2616_v38 = vadd.f32 %v2615_v33, %v2614_v27 }
 0xa45   :  { %v2631_v40 = vmul.f32 0.25, %v2609_v35  ;;  %v2635_v41 = vmul.f32 %v4386_v34, %v4386_v34 }
 0xa46   :  { %v2632_v42 = vmul.f32 0.25, %v2616_v38  ;;  %v2636_v43 = vmul.f32 %v4388_v37, %v4388_v37 }
 0xa47   :  { %v2639_v44 = vsub.f32 %v2631_v40, %v2635_v41 }
 0xa48   :  { %v2640_v45 = vsub.f32 %v2632_v42, %v2636_v43 }
 0xa49   :  { %v2643_v47 = vadd.f32 1e-05, %v2639_v44 }
 0xa4a   :  { %v2644_v48 = vadd.f32 1e-05, %v2640_v45  ;;  %v3263_v45 = vld [vmem:[%s4510_s8 + $0x6] ss:$8 sm:$0xf] }
 0xa4b   :  { %3798 = vrsqrt.f32 %v2643_v47 }
 0xa4c   :  { %3800 = vrsqrt.f32 %v2644_v48  ;;  %v2692_v48 = vsub.s32 2, %v4337_v30 }
 0xa55   :  { %v3799_v51 = vpop.eup %3798 }
 0xa56   :  { %v3801_v52 = vpop.eup %3800 }
 0xa57   :  { %v2655_v53 = vcombine.low %v3799_v51, %v3801_v52  ;;  %v2696_v51 = vsub.s32 3, %v4337_v30 }
 0xa59   :  { %v2663_v42 = vrot.slane %v2655_v53, %v4340_v32 }
 0xa75   :  { %v4394_v36 = vpop.f32.mrb[80].mxu1 }
 0xa76   :  { %v2581_v54 = vsel %vm1677_vm6, %v4394_v36, 0.0  ;;  %v2601_v55 = vmul.f32 %v4394_v36, %v4394_v36  ;;  %v4400_v56 = vpop.f32.mrb[81].mxu1 }
 0xa77   :  { %v2582_v57 = vrot.slane %v2581_v54, 4  ;;  %v2588_v58 = vsel %vm1677_vm6, %v4400_v56, 0.0  ;;  %v2602_v46 = vmul.f32 %v4400_v56, %v4400_v56  ;;  %v2560_v49 = vpop.f32.mrb[82].mxu1 }
 0xa78   :  { %v2617_v60 = vsel %vm1677_vm6, %v2601_v55, 0.0  ;;  %v2589_v61 = vrot.slane %v2588_v58, 4  ;;  %v2561_v62 = vpop.f32.mrb[83].mxu1 }
 0xa79   :  { %v2583_v63 = vadd.f32 %v2582_v57, %v2581_v54  ;;  %v2618_v0 = vrot.slane %v2617_v60, 4  ;;  %v2624_v2 = vsel %vm1677_vm6, %v2602_v46, 0.0 }
 0xa7a   :  { %v2590_v3 = vadd.f32 %v2589_v61, %v2588_v58  ;;  %v2625_v4 = vrot.slane %v2624_v2, 4 }
 0xa7b   :  { %v2584_v5 = vrot.slane %v2583_v63, 2  ;;  %v2619_v6 = vadd.f32 %v2618_v0, %v2617_v60 }
 0xa7c   :  { %v2591_v7 = vrot.slane %v2590_v3, 2  ;;  %v2626_v59 = vadd.f32 %v2625_v4, %v2624_v2 }
 0xa7d   :  { %v2585_v8 = vadd.f32 %v2584_v5, %v2583_v63  ;;  %v2620_v9 = vrot.slane %v2619_v6, 2 }
 0xa7e   :  { %v2592_v10 = vadd.f32 %v2591_v7, %v2590_v3  ;;  %v2627_v12 = vrot.slane %v2626_v59, 2 }
 0xa7f   :  { %v2586_v13 = vrot.slane %v2585_v8, 1  ;;  %v2621_v14 = vadd.f32 %v2620_v9, %v2619_v6 }
 0xa80   :  { %v2593_v15 = vrot.slane %v2592_v10, 1  ;;  %v2628_v16 = vadd.f32 %v2627_v12, %v2626_v59 }
 0xa81   :  { %v2587_v17 = vadd.f32 %v2586_v13, %v2585_v8  ;;  %v2622_v18 = vrot.slane %v2621_v14, 1 }
 0xa82   :  { %v2594_v19 = vadd.f32 %v2593_v15, %v2592_v10  ;;  %v2629_v20 = vrot.slane %v2628_v16, 1 }
 0xa83   :  { %v2597_v21 = vmul.f32 0.25, %v2587_v17  ;;  %v2623_v22 = vadd.f32 %v2622_v18, %v2621_v14 }
 0xa84   :  { %v2598_v23 = vmul.f32 0.25, %v2594_v19  ;;  %v2630_v24 = vadd.f32 %v2629_v20, %v2628_v16 }
 0xa85   :  { %v2633_v25 = vmul.f32 0.25, %v2623_v22  ;;  %v2637_v26 = vmul.f32 %v2597_v21, %v2597_v21 }
 0xa86   :  { %v2634_v27 = vmul.f32 0.25, %v2630_v24  ;;  %v2638_v28 = vmul.f32 %v2598_v23, %v2598_v23 }
 0xa87   :  { %v2641_v29 = vsub.f32 %v2633_v25, %v2637_v26 }
 0xa88   :  { %v2642_v31 = vsub.f32 %v2634_v27, %v2638_v28 }
 0xa89   :  { %v2645_v33 = vadd.f32 1e-05, %v2641_v29 }
 0xa8a   :  { %v2646_v35 = vadd.f32 1e-05, %v2642_v31 }
 0xa8b   :  { %3802 = vrsqrt.f32 %v2645_v33 }
 0xa8c   :  { %3804 = vrsqrt.f32 %v2646_v35 }
 0xa95   :  { %v3803_v38 = vpop.eup %3802 }
 0xa96   :  { %v3805_v40 = vpop.eup %3804 }
 0xa97   :  { %v2656_v41 = vcombine.low %v3803_v38, %v3805_v40 }
 0xa99   :  { %v2670_v43 = vrot.slane %v2656_v41, %v4340_v32 }
 0xa9b   :  { %v2671_v44 = vcombine.low %v2663_v42, %v2670_v43 }
 0xa9d   :  { %v2678_v47 = vrot.slane %v2671_v44, %v4340_v32 }
 0xa9f   :  { %v2680_v52 = vmul.f32 %v3263_v45, %v2678_v47 }
 0xaa1   :  { %v2685_v54 = vrot.slane %v2680_v52, %v4348_v11  ;;  %v2689_v55 = vrot.slane %v2680_v52, %v4351_v39  ;;  %v2693_v57 = vrot.slane %v2680_v52, %v2692_v48  ;;  %v2697_v53 = vrot.slane %v2680_v52, %v2696_v51 }
 0xaa3   :  { %v2702_v58 = vmul.f32 %v2685_v54, %v4386_v34  ;;  %v2703_v46 = vmul.f32 %v2689_v55, %v4388_v37  ;;  %v2704_v49 = vmul.f32 %v2693_v57, %v2597_v21  ;;  %v2705_v60 = vmul.f32 %v2697_v53, %v2598_v23  ;;  %v3264_v34 = vld [vmem:[%s4510_s8 + $0x7] ss:$8 sm:$0xf] }
 0xaa4   :  { %v2736_v61 = vmul.f32 %v2685_v54, %v4372_v1  ;;  %v2737_v62 = vmul.f32 %v2689_v55, %v4378_v50  ;;  %v2738_v63 = vmul.f32 %v2693_v57, %v4394_v36  ;;  %v2739_v30 = vmul.f32 %v2697_v53, %v4400_v56 }
 0xaa5   :  { %v2710_v0 = vcombine.low %v2702_v58, %v2703_v46  ;;  %v2711_v2 = vcombine.low %v2704_v49, %v2705_v60 }
 0xaa7   :  { %v2718_v3 = vrot.slane %v2710_v0, %v4340_v32  ;;  %v2725_v4 = vrot.slane %v2711_v2, %v4340_v32 }
 0xaa9   :  { %v2726_v5 = vcombine.low %v2718_v3, %v2725_v4 }
 0xaab   :  { %v2733_v37 = vrot.slane %v2726_v5, %v4340_v32 }
 0xaad   :  { %v2735_v1 = vsub.f32 %v3264_v34, %v2733_v37 }
 0xaaf   :  { %v2744_v50 = vrot.slane %v2735_v1, %v4348_v11  ;;  %v2748_v36 = vrot.slane %v2735_v1, %v4351_v39  ;;  %v2752_v6 = vrot.slane %v2735_v1, %v2692_v48  ;;  %v2756_v56 = vrot.slane %v2735_v1, %v2696_v51 }
 0xab1   :  { %v2761_v7 = vadd.f32 %v2744_v50, %v2736_v61  ;;  %v2762_v59 = vadd.f32 %v2748_v36, %v2737_v62  ;;  %v2763_v8 = vadd.f32 %v2752_v6, %v2738_v63  ;;  %v2764_v9 = vadd.f32 %v2756_v56, %v2739_v30 }
 0xab3   :  { %v2765_v10 = vmax.f32 %v2761_v7, 0.0  ;;  %v2766_v12 = vmax.f32 %v2762_v59, 0.0  ;;  %v2767_v13 = vmax.f32 %v2763_v8, 0.0  ;;  %v2768_v14 = vmax.f32 %v2764_v9, 0.0 }
 0xab5   :  { %v4432_v15 = vpack.c.bf16 %v2765_v10, %v2765_v10  ;;  %v2770_v16 = vpack.c.bf16 %v2766_v12, %v2766_v12  ;;  %v4434_v17 = vpack.c.bf16 %v2767_v13, %v2767_v13  ;;  %v4436_v32 = vpack.c.bf16 %v2768_v14, %v2768_v14 }
 0xab7   :  { %v2774_v11 = vshrl.u32 %v4432_v15, 16  ;;  %v2777_v39 = vshrl.u32 %v2770_v16, 16  ;;  %v2780_v18 = vshrl.u32 %v4434_v17, 16  ;;  %v2783_v19 = vshrl.u32 %v4436_v32, 16 }
 0xab8   :  { %v2789_v20 = vshll.u32 %v4432_v15, 16  ;;  %v2792_v21 = vshll.u32 %v2770_v16, 16  ;;  %v2795_v22 = vshll.u32 %v4434_v17, 16  ;;  %v2798_v23 = vshll.u32 %v4436_v32, 16 }
 0xab9   :  { %v2802_v24 = vshll.u32 %v2774_v11, 16  ;;  %v2806_v25 = vshll.u32 %v2777_v39, 16  ;;  %v2810_v26 = vshll.u32 %v2780_v18, 16  ;;  %v2814_v27 = vshll.u32 %v2783_v19, 16 }
 0xaba   :  { %v2791_v29 = vrot.slane %v2789_v20, 1  ;;  %v2794_v31 = vrot.slane %v2792_v21, 1  ;;  %v4448_v33 = vrot.slane %v2795_v22, 1  ;;  %v2800_v35 = vrot.slane %v2798_v23, 1 }
 0xabb   :  { %v2804_v38 = vrot.slane %v2802_v24, 1  ;;  %v2808_v40 = vrot.slane %v2806_v25, 1  ;;  %v2812_v41 = vrot.slane %v2810_v26, 1  ;;  %v2816_v42 = vrot.slane %v2814_v27, 1 }
 0xabc   :  { %v2828_v43 = vsel %vm4444_vm11, %v4432_v15, %v2791_v29  ;;  %v2829_v44 = vsel %vm4444_vm11, %v2770_v16, %v2794_v31  ;;  %v2830_v45 = vsel %vm4444_vm11, %v4434_v17, %v4448_v33  ;;  %v2831_v47 = vsel %vm4444_vm11, %v4436_v32, %v2800_v35 }
 0xabd   :  { %v4464_v48 = vsel %vm4444_vm11, %v2774_v11, %v2804_v38  ;;  %v4468_v51 = vsel %vm4444_vm11, %v2777_v39, %v2808_v40  ;;  %v4472_v52 = vsel %vm4444_vm11, %v2780_v18, %v2812_v41  ;;  %v4476_v54 = vsel %vm4444_vm11, %v2783_v19, %v2816_v42 }
 0xabe   :  { %3878 = dma.done.wait [#allocation5 + $0x2], 8192 }
 0xabf   :  { %3879 = vsyncadd [#allocation5 + $0x2], 4294959104  ;;  %2943 = vmatprep.mubr.bf16.mxu1 %v2829_v44  ;;  %v2848_v55 = vld [vmem:[#allocation4 + $0x40] sm:$0xff]  ;;  %v2849_v53 = vld [vmem:[#allocation4 + $0x48] sm:$0xff]  ;;  %s3900_s22 = smov [#allocation9]  }
 0xac0   :  { %v2840_v57 = vld [vmem:[#allocation4] sm:$0xff]  ;;  %3436 = vmatprep.subr.bf16.mxu1 %v2848_v55  ;;  %v2841_v58 = vld [vmem:[#allocation4 + $0x8] sm:$0xff]  ;;  %v2850_v46 = vld [vmem:[#allocation4 + $0x50] sm:$0xff]  ;;  %s3078_s0 = sshll.u32 %s3900_s22, 4  ;;  %s3079_s0 = int_to_ptr.vmem [resolvable:$true] %s3078_s0 }
 0xac1   :  { %3437 = vmatpush3.bf16.msra.mxu1 %v2840_v57  ;;  %v2842_v49 = vld [vmem:[#allocation4 + $0x10] sm:$0xff]  ;;  %v2851_v60 = vld [vmem:[#allocation4 + $0x58] sm:$0xff]  ;;  %v2852_v62 = vld [vmem:[#allocation4 + $0x60] sm:$0xff]  ;;  %p3855_p3 = scmp.lt.s32.totalorder %s3079_s0, %s3079_s0 }
 0xac2   :  { %3438 = vmatprep.subr.bf16.mxu1 %v2849_v53  ;;  %v2843_v61 = vld [vmem:[#allocation4 + $0x18] sm:$0xff]  ;;  %v2844_v63 = vld [vmem:[#allocation4 + $0x20] sm:$0xff]  ;;  %v2853_v30 = vld [vmem:[#allocation4 + $0x68] sm:$0xff] }
 0xac3   :  { %v2845_v0 = vld [vmem:[#allocation4 + $0x28] sm:$0xff]  ;;  %v2854_v2 = vld [vmem:[#allocation4 + $0x70] sm:$0xff]  ;;  %v2855_v4 = vld [vmem:[#allocation4 + $0x78] sm:$0xff] }
 0xac4   :  { %v2846_v3 = vld [vmem:[#allocation4 + $0x30] sm:$0xff]  ;;  %v2847_v5 = vld [vmem:[#allocation4 + $0x38] sm:$0xff]  ;;  %v2864_v34 = vld [vmem:[#allocation4 + $0xc0] sm:$0xff] }
 0xac5   :  { %3439 = vmatpush3.bf16.msra.mxu1 %v2841_v58  ;;  %v2856_v37 = vld [vmem:[#allocation4 + $0x80] sm:$0xff]  ;;  %v2865_v1 = vld [vmem:[#allocation4 + $0xc8] sm:$0xff]  ;;  %v2866_v36 = vld [vmem:[#allocation4 + $0xd0] sm:$0xff] }
 0xac6   :  { %3440 = vmatprep.subr.bf16.mxu1 %v2850_v46  ;;  %v2857_v50 = vld [vmem:[#allocation4 + $0x88] sm:$0xff]  ;;  %v2858_v6 = vld [vmem:[#allocation4 + $0x90] sm:$0xff]  ;;  %v2867_v56 = vld [vmem:[#allocation4 + $0xd8] sm:$0xff] }
 0xac7   :  { %v2859_v7 = vld [vmem:[#allocation4 + $0x98] sm:$0xff]  ;;  %v2868_v59 = vld [vmem:[#allocation4 + $0xe0] sm:$0xff]  ;;  %v2869_v9 = vld [vmem:[#allocation4 + $0xe8] sm:$0xff] }
 0xac8   :  { %v2860_v8 = vld [vmem:[#allocation4 + $0xa0] sm:$0xff]  ;;  %v2861_v10 = vld [vmem:[#allocation4 + $0xa8] sm:$0xff]  ;;  %v2870_v12 = vld [vmem:[#allocation4 + $0xf0] sm:$0xff] }
 0xac9   :  { %3441 = vmatpush3.bf16.msra.mxu1 %v2842_v49  ;;  %v2862_v13 = vld [vmem:[#allocation4 + $0xb0] sm:$0xff]  ;;  %v2871_v14 = vld [vmem:[#allocation4 + $0xf8] sm:$0xff]  ;;  %v2880_v16 = vld [vmem:[#allocation4 + $0x140] sm:$0xff] }
 0xaca   :  { %3442 = vmatprep.subr.bf16.mxu1 %v2851_v60  ;;  %v2863_v15 = vld [vmem:[#allocation4 + $0xb8] sm:$0xff]  ;;  %v2872_v32 = vld [vmem:[#allocation4 + $0x100] sm:$0xff]  ;;  %v2881_v11 = vld [vmem:[#allocation4 + $0x148] sm:$0xff] }
 0xacb   :  { %v2873_v39 = vld [vmem:[#allocation4 + $0x108] sm:$0xff]  ;;  %v2882_v18 = vld [vmem:[#allocation4 + $0x150] sm:$0xff]  ;;  %v2883_v20 = vld [vmem:[#allocation4 + $0x158] sm:$0xff] }
 0xacc   :  { %v2874_v19 = vld [vmem:[#allocation4 + $0x110] sm:$0xff]  ;;  %v2875_v21 = vld [vmem:[#allocation4 + $0x118] sm:$0xff]  ;;  %v2884_v22 = vld [vmem:[#allocation4 + $0x160] sm:$0xff] }
 0xacd   :  { %3443 = vmatpush3.bf16.msra.mxu1 %v2843_v61  ;;  %v2876_v23 = vld [vmem:[#allocation4 + $0x120] sm:$0xff]  ;;  %v2885_v24 = vld [vmem:[#allocation4 + $0x168] sm:$0xff]  ;;  %v2886_v25 = vld [vmem:[#allocation4 + $0x170] sm:$0xff] }
 0xace   :  { %3444 = vmatprep.subr.bf16.mxu1 %v2852_v62  ;;  %v2877_v17 = vld [vmem:[#allocation4 + $0x128] sm:$0xff]  ;;  %v2878_v26 = vld [vmem:[#allocation4 + $0x130] sm:$0xff]  ;;  %v2887_v27 = vld [vmem:[#allocation4 + $0x178] sm:$0xff] }
 0xacf   :  { %v2879_v28 = vld [vmem:[#allocation4 + $0x138] sm:$0xff]  ;;  %v2896_v29 = vld [vmem:[#allocation4 + $0x1c0] sm:$0xff]  ;;  %v2897_v33 = vld [vmem:[#allocation4 + $0x1c8] sm:$0xff] }
 0xad0   :  { %v2888_v31 = vld [vmem:[#allocation4 + $0x180] sm:$0xff]  ;;  %v2889_v35 = vld [vmem:[#allocation4 + $0x188] sm:$0xff]  ;;  %v2898_v38 = vld [vmem:[#allocation4 + $0x1d0] sm:$0xff] }
 0xad1   :  { %3445 = vmatpush3.bf16.msra.mxu1 %v2844_v63  ;;  %v2890_v40 = vld [vmem:[#allocation4 + $0x190] sm:$0xff]  ;;  %v2899_v41 = vld [vmem:[#allocation4 + $0x1d8] sm:$0xff]  ;;  %v2892_v44 = vld [vmem:[#allocation4 + $0x1a0] sm:$0xff] }
 0xad2   :  { %3446 = vmatprep.subr.bf16.mxu1 %v2853_v30  ;;  %v2891_v42 = vld [vmem:[#allocation4 + $0x198] sm:$0xff]  ;;  %v3265_v60 = vld [vmem:[%s4511_s9] ss:$0 sm:$0xff]  ;;  %s3850_s9 = scalar_lea.vmem %s3079_s0, 32 }
 0xad3   :  { %v2895_v55 = vld [vmem:[#allocation4 + $0x1b8] sm:$0xff]  ;;  %p3851_p2 = scmp.ne.s32.totalorder %s3079_s0, %s3850_s9  ;;  %p3856_p4 = scmp.lt.s32.totalorder %s3850_s9, %s3850_s9 }
 0xad5   :  { %3447 = vmatpush3.bf16.msra.mxu1 %v2845_v0  ;;  %p3857_p5 = por %p3856_p4, %p3855_p3 }
 0xad6   :  { %3448 = vmatprep.subr.bf16.mxu1 %v2854_v2 }
 0xad7   :  { %p3858_p6 = pnand %p3857_p5, %p3851_p2 }
 0xad9   :  { %3449 = vmatpush3.bf16.msra.mxu1 %v2846_v3 }
 0xada   :  { %3450 = vmatprep.subr.bf16.mxu1 %v2855_v4 }
 0xadd   :  { %3451 = vmatpush3.bf16.msra.mxu1 %v2847_v5 }
 0xade   :  { %3458 = vmatprep.subr.bf16.mxu1 %v2864_v34 }
 0xae0   :  { %2944 = vmatmul.mubr.bf16.vlgmr.msra.gmra.mrb[84].mxu1 %v2828_v43  ;;  %v2900_v43 = vld [vmem:[#allocation4 + $0x1e0] sm:$0xff] }
 0xae1   :  { %3459 = vmatpush3.bf16.msra.mxu1 %v2856_v37  ;;  %2983 = vmatprep.mubr.bf16.mxu1 %v2831_v47  ;;  %v2893_v47 = vld [vmem:[#allocation4 + $0x1a8] sm:$0xff] }
 0xae2   :  { %3460 = vmatprep.subr.bf16.mxu1 %v2865_v1 }
 0xae5   :  { %3461 = vmatpush3.bf16.msra.mxu1 %v2857_v50 }
 0xae6   :  { %3462 = vmatprep.subr.bf16.mxu1 %v2866_v36 }
 0xae9   :  { %3463 = vmatpush3.bf16.msra.mxu1 %v2858_v6 }
 0xaea   :  { %3464 = vmatprep.subr.bf16.mxu1 %v2867_v56 }
 0xaed   :  { %3465 = vmatpush3.bf16.msra.mxu1 %v2859_v7 }
 0xaee   :  { %3466 = vmatprep.subr.bf16.mxu1 %v2868_v59 }
 0xaf1   :  { %3467 = vmatpush3.bf16.msra.mxu1 %v2860_v8 }
 0xaf2   :  { %3468 = vmatprep.subr.bf16.mxu1 %v2869_v9 }
 0xaf5   :  { %3469 = vmatpush3.bf16.msra.mxu1 %v2861_v10 }
 0xaf6   :  { %3470 = vmatprep.subr.bf16.mxu1 %v2870_v12 }
 0xaf9   :  { %3471 = vmatpush3.bf16.msra.mxu1 %v2862_v13 }
 0xafa   :  { %3472 = vmatprep.subr.bf16.mxu1 %v2871_v14 }
 0xafd   :  { %3473 = vmatpush3.bf16.msra.mxu1 %v2863_v15 }
 0xafe   :  { %3480 = vmatprep.subr.bf16.mxu1 %v2880_v16 }
 0xb00   :  { %2984 = vmatmul.mubr.bf16.vlgmr.msra.gmra.mrb[88].mxu1 %v2830_v45  ;;  %v2901_v45 = vld [vmem:[#allocation4 + $0x1e8] sm:$0xff] }
 0xb01   :  { %3481 = vmatpush3.bf16.msra.mxu1 %v2872_v32  ;;  %3023 = vmatprep.mubr.bf16.mxu1 %v4468_v51  ;;  %v2894_v51 = vld [vmem:[#allocation4 + $0x1b0] sm:$0xff] }
 0xb02   :  { %3482 = vmatprep.subr.bf16.mxu1 %v2881_v11 }
 0xb05   :  { %3483 = vmatpush3.bf16.msra.mxu1 %v2873_v39 }
 0xb06   :  { %3484 = vmatprep.subr.bf16.mxu1 %v2882_v18 }
 0xb09   :  { %3485 = vmatpush3.bf16.msra.mxu1 %v2874_v19 }
 0xb0a   :  { %3486 = vmatprep.subr.bf16.mxu1 %v2883_v20 }
 0xb0d   :  { %3487 = vmatpush3.bf16.msra.mxu1 %v2875_v21 }
 0xb0e   :  { %3488 = vmatprep.subr.bf16.mxu1 %v2884_v22 }
 0xb11   :  { %3489 = vmatpush3.bf16.msra.mxu1 %v2876_v23 }
 0xb12   :  { %3490 = vmatprep.subr.bf16.mxu1 %v2885_v24 }
 0xb15   :  { %3491 = vmatpush3.bf16.msra.mxu1 %v2877_v17 }
 0xb16   :  { %3492 = vmatprep.subr.bf16.mxu1 %v2886_v25 }
 0xb19   :  { %3493 = vmatpush3.bf16.msra.mxu1 %v2878_v26 }
 0xb1a   :  { %3494 = vmatprep.subr.bf16.mxu1 %v2887_v27 }
 0xb1d   :  { %3495 = vmatpush3.bf16.msra.mxu1 %v2879_v28 }
 0xb1e   :  { %3502 = vmatprep.subr.bf16.mxu1 %v2896_v29 }
 0xb20   :  { %3024 = vmatmul.mubr.bf16.vlgmr.msra.gmra.mrb[92].mxu1 %v4464_v48  ;;  %v2902_v48 = vld [vmem:[#allocation4 + $0x1f0] sm:$0xff] }
 0xb21   :  { %3503 = vmatpush3.bf16.msra.mxu1 %v2888_v31  ;;  %3063 = vmatprep.mubr.bf16.mxu1 %v4476_v54  ;;  %v2903_v54 = vld [vmem:[#allocation4 + $0x1f8] sm:$0xff] }
 0xb22   :  { %3504 = vmatprep.subr.bf16.mxu1 %v2897_v33 }
 0xb25   :  { %3505 = vmatpush3.bf16.msra.mxu1 %v2889_v35 }
 0xb26   :  { %3506 = vmatprep.subr.bf16.mxu1 %v2898_v38 }
 0xb29   :  { %3507 = vmatpush3.bf16.msra.mxu1 %v2890_v40 }
 0xb2a   :  { %3508 = vmatprep.subr.bf16.mxu1 %v2899_v41 }
 0xb2d   :  { %3509 = vmatpush3.bf16.msra.mxu1 %v2891_v42 }
 0xb2e   :  { %3510 = vmatprep.subr.bf16.mxu1 %v2900_v43 }
 0xb31   :  { %3511 = vmatpush3.bf16.msra.mxu1 %v2892_v44 }
 0xb32   :  { %3512 = vmatprep.subr.bf16.mxu1 %v2901_v45 }
 0xb35   :  { %3513 = vmatpush3.bf16.msra.mxu1 %v2893_v47 }
 0xb36   :  { %3514 = vmatprep.subr.bf16.mxu1 %v2902_v48 }
 0xb39   :  { %3515 = vmatpush3.bf16.msra.mxu1 %v2894_v51 }
 0xb3a   :  { %3516 = vmatprep.subr.bf16.mxu1 %v2903_v54 }
 0xb3d   :  { %3517 = vmatpush3.bf16.msra.mxu1 %v2895_v55 }
 0xb40   :  { %3064 = vmatmul.mubr.bf16.vlgmr.msra.gmra.mrb[96].mxu1 %v4472_v52 }
 0xbb3   :  { %v3452_v57 = vpop.f32.mrb[84].mxu1 }
 0xbb4   :  { %v3453_v53 = vpop.f32.mrb[85].mxu1 }
 0xbb5   :  { %v3454_v58 = vadd.f32 %v3453_v53, %v3452_v57  ;;  %v3455_v46 = vpop.f32.mrb[86].mxu1 }
 0xbb6   :  { %v3456_v49 = vpop.f32.mrb[87].mxu1 }
 0xbb7   :  { %v2946_v63 = vadd.f32 %v3454_v58, %v3265_v60 }
 0xbd3   :  { %v3474_v61 = vpop.f32.mrb[88].mxu1 }
 0xbd4   :  { %v3475_v62 = vpop.f32.mrb[89].mxu1 }
 0xbd5   :  { %v3476_v30 = vadd.f32 %v3475_v62, %v3474_v61  ;;  %v3477_v0 = vpop.f32.mrb[90].mxu1 }
 0xbd6   :  { %v3478_v2 = vpop.f32.mrb[91].mxu1 }
 0xbd7   :  { %v2986_v3 = vadd.f32 %v3476_v30, %v2946_v63 }
 0xbf3   :  { %v3496_v4 = vpop.f32.mrb[92].mxu1 }
 0xbf4   :  { %v3497_v5 = vpop.f32.mrb[93].mxu1 }
 0xbf5   :  { %v3498_v34 = vadd.f32 %v3497_v5, %v3496_v4  ;;  %v3499_v52 = vpop.f32.mrb[94].mxu1 }
 0xbf6   :  { %v3500_v37 = vpop.f32.mrb[95].mxu1 }
 0xbf7   :  { %v3026_v1 = vadd.f32 %v3498_v34, %v2986_v3 }
 0xc13   :  { %v3518_v50 = vpop.f32.mrb[96].mxu1 }
 0xc14   :  { %v3519_v36 = vpop.f32.mrb[97].mxu1 }
 0xc15   :  { %v3520_v6 = vadd.f32 %v3519_v36, %v3518_v50  ;;  %v3521_v56 = vpop.f32.mrb[98].mxu1 }
 0xc16   :  { %v3522_v7 = vpop.f32.mrb[99].mxu1 }
 0xc17   :  { %v3066_v59 = vadd.f32 %v3520_v6, %v3026_v1 }
 0xc19   :  { %3071 = vst [vmem:[#allocation9] sm:$0x3] %v3066_v59 }
 0xc1a   :  { %3861 = shalt.err (!%p3858_p6)
}
 0xc1b   :  { %s3862_s24 = scalar_lea.hbm %s4515_s13, 32 }
 0xc1c   :  { %p3863_p7 = scmp.ne.s32.totalorder %s4515_s13, %s3862_s24  ;;  %p3866_p8 = scmp.lt.u32.totalorder %s3862_s24, %s4515_s13 }
 0xc1e   :  { %p3868_p9 = pnand %p3866_p8, %p3863_p7 }
 0xc20   :  { %3871 = shalt.err (!%p3868_p9)
}
 0xc21   :  { %3081 = dma.vmem_to_hbm [thread:$0]  %s3079_s0, 32, %s4515_s13, [#allocation8]  }
 0xc22   :  { %3880 = dma.done.wait [#allocation8], 32  }
 0xc23   :  { %3881 = vsyncadd [#allocation8], 4294967264 }
 0xc24   :  { %3085 = vsyncpa [#allocation7], 1 }
 0xc25   :  { %3086 = vsyncpa [#allocation8], 1 }
 0xc26   :  { %3087 = vsyncmov [#allocation5] }
 0xc29   :  { %s3088_s25 = vpop.sfrf %3087 }
 0xc2a   :  { %p3266_p10 = scmp.ne.s32.totalorder %s3088_s25, 0 }
 0xc2c   :  { %3092 = shalt.err (%p3266_p10)  }
 0xc2d   :  { %3094 = vsyncmov [#allocation5 + $0x1] }
 0xc30   :  { %s3095_s18 = vpop.sfrf %3094 }
 0xc31   :  { %p3267_p11 = scmp.ne.s32.totalorder %s3095_s18, 0 }
 0xc33   :  { %3099 = shalt.err (%p3267_p11)  }
 0xc34   :  { %3101 = vsyncmov [#allocation5 + $0x2] }
 0xc37   :  { %s3102_s19 = vpop.sfrf %3101 }
 0xc38   :  { %p3268_p12 = scmp.ne.s32.totalorder %s3102_s19, 0 }
 0xc3a   :  { %3106 = shalt.err (%p3268_p12)  }

</bundles_post_ra>
